<compile_context>
chip_gen: v7x
topology: tpu7x:2x2x1
jax: 0.10.0
libtpu: 0.0.40
codegen_flags: <defaults>
</compile_context>

<pallas_src>
import math
from functools import partial

import jax
import jax.numpy as jnp
from jax.experimental import pallas as pl
from jax.experimental.pallas import tpu as pltpu


def _make_weighted_grid_loss_kernel(inv_count):
    def kernel(x_ref, t_ref, w_ref, b_ref, out_ref, acc_ref):
        # x_ref, t_ref : [bz, I]        f32  -- SH coefficients (raw, no host preprocessing)
        # w_ref        : [I, block_g]   bf16 -- coeff->grid matrix tile (resident per G tile)
        # b_ref        : [1, block_g]   f32  -- 1.0 in padded lanes, 0.0 in valid lanes
        # out_ref      : [1, 1]         f32  SMEM -- final loss (written once, at finalize)
        # acc_ref      : [bz, block_g]  f32  VMEM -- elementwise partial-sum accumulator
        zi = pl.program_id(0)
        gi = pl.program_id(1)

        @pl.when((zi == 0) & (gi == 0))
        def _init():
            out_ref[0, 0] = 0.0
            acc_ref[...] = jnp.zeros_like(acc_ref)

        xf = x_ref[...]
        tf = t_ref[...]
        w = w_ref[...]

        # Difference in coefficient space (f32 subtract, then bf16 for the MXU).
        d_bf = (xf - tf).astype(jnp.bfloat16)
        t_bf = tf.astype(jnp.bfloat16)

        dg = jnp.dot(d_bf, w, preferred_element_type=jnp.float32)   # (x - t) on the S2 grid
        tg = jnp.dot(t_bf, w, preferred_element_type=jnp.float32)   # target on the S2 grid
        # Padded lanes: W columns are zero so dg == 0 there; the bias row makes tg == 1.0 so
        # the approx reciprocal never sees 0 and the padded contribution is exactly 0.
        tg = tg + b_ref[...]

        # (x_grid - t_grid)^2 / t_grid, divide via EUP approx reciprocal; pure VALU accumulate.
        acc_ref[...] += (dg * dg) * pl.reciprocal(tg, approx=True)

        @pl.when((zi == pl.num_programs(0) - 1) & (gi == pl.num_programs(1) - 1))
        def _finalize():
            out_ref[0, 0] = jnp.sum(acc_ref[...]) * inv_count

    return kernel


def build_coeff_to_grid_matrix(shb, sha, lane_multiple=128):
    """Module-init glue: fold ToS2Grid's two einsums into one [I, G] matrix.

    W[i, b*res_alpha + a] = sum_m shb[m, b, i] * sha[a, m]; padded with zero columns to a
    multiple of 128 lanes and cast to bf16 (the in-kernel matmul accumulates in f32).
    Also returns the constant lane-padding bias row (1.0 in pad lanes, 0.0 in valid lanes).
    Returns (w_padded[bf16, I x G_pad], bias[f32, 1 x G_pad], g_actual).
    """
    n_coeff = shb.shape[-1]
    w = jnp.einsum('mbi,am->iba', shb, sha, precision='highest').reshape(n_coeff, -1)
    g_actual = w.shape[-1]
    g_pad = ((g_actual + lane_multiple - 1) // lane_multiple) * lane_multiple
    w = jnp.pad(w, ((0, 0), (0, g_pad - g_actual)))
    bias = (jnp.arange(g_pad) >= g_actual).astype(jnp.float32)[None, :]
    return w.astype(jnp.bfloat16), bias, g_actual


@partial(jax.jit, static_argnames=("g_actual", "block_z", "block_g"))
def weighted_grid_loss(x, t, w_padded, bias, *, g_actual, block_z=128, block_g=None):
    """x, t: [Z, (lmax+1)^2] SH coefficients; w_padded/bias prebuilt at module init."""
    z, n_coeff = x.shape
    g_pad = w_padded.shape[-1]

    xf = x.astype(jnp.float32)
    tf = t.astype(jnp.float32)

    if z <= max(block_z, 8):
        # Common (small-batch) path: one Z block covering the full arrays -> zero host staging.
        bz = z
        nb_z = 1
        x_in, t_in = xf, tf
    else:
        # Large-Z path: tile Z; pad by replicating a real target row (d == 0, target_grid > 0).
        bz = max(8, (block_z // 8) * 8)
        z_pad = pl.cdiv(z, bz) * bz
        if z_pad != z:
            pad = jnp.broadcast_to(tf[-1:], (z_pad - z, n_coeff))
            x_in = jnp.concatenate([xf, pad], axis=0)
            t_in = jnp.concatenate([tf, pad], axis=0)
        else:
            x_in, t_in = xf, tf
        nb_z = z_pad // bz

    if block_g is None:
        # Tiny batches: one fused step over all of G. Large batches: 1024-lane G tiles so the
        # f32 matmul intermediate stays small (VMEM-friendly on v7x's 64 MiB as well).
        block_g = g_pad if (bz <= 8 or g_pad <= 1024) else 1024
    if g_pad % block_g != 0:
        block_g = g_pad
    nb_g = g_pad // block_g

    inv_count = 1.0 / float(z * g_actual)
    kernel = _make_weighted_grid_loss_kernel(inv_count)

    cost = pl.CostEstimate(
        flops=int(2 * 2 * z * n_coeff * g_pad + 4 * z * g_pad),
        transcendentals=int(z * g_pad),
        bytes_accessed=int(x_in.size * 4 + t_in.size * 4 + w_padded.size * 2
                           + bias.size * 4 + 4),
    )

    out = pl.pallas_call(
        kernel,
        out_shape=jax.ShapeDtypeStruct((1, 1), jnp.float32),
        grid_spec=pltpu.PrefetchScalarGridSpec(
            num_scalar_prefetch=0,
            grid=(nb_z, nb_g),
            in_specs=[
                pl.BlockSpec((bz, n_coeff), lambda zi, gi: (zi, 0)),      # x
                pl.BlockSpec((bz, n_coeff), lambda zi, gi: (zi, 0)),      # t
                pl.BlockSpec((n_coeff, block_g), lambda zi, gi: (0, gi)),  # W tile
                pl.BlockSpec((1, block_g), lambda zi, gi: (0, gi)),        # lane-pad bias
            ],
            out_specs=pl.BlockSpec((1, 1), lambda zi, gi: (0, 0),
                                   memory_space=pltpu.MemorySpace.SMEM),
            scratch_shapes=[pltpu.VMEM((bz, block_g), jnp.float32)],
        ),
        compiler_params=pltpu.CompilerParams(
            dimension_semantics=("arbitrary", "arbitrary"),  # shared accumulator across grid
        ),
        cost_estimate=cost,
    )(x_in, t_in, w_padded, bias)
    return out[0, 0]


if __name__ == "__main__":
    # Shapes implied by the module: ToS2Grid(lmax, (res_beta=100, res_alpha=51), 'integral')
    lmax = 3
    res_beta, res_alpha = 100, 51
    n_coeff = (lmax + 1) ** 2          # 16
    n_m = 2 * lmax + 1                 # 7
    Z = 2                              # batch of signals

    key = jax.random.PRNGKey(0)
    k_shb, k_x, k_t, k_x0 = jax.random.split(key, 4)

    # alpha (Fourier) basis sha: [res_alpha, 2*lmax+1]
    alphas = jnp.arange(res_alpha, dtype=jnp.float32) / res_alpha * (2.0 * math.pi)
    cols = []
    for j in range(n_m):
        m = j - lmax
        if m < 0:
            cols.append(math.sqrt(2.0) * jnp.sin(-m * alphas))
        elif m == 0:
            cols.append(jnp.ones_like(alphas))
        else:
            cols.append(math.sqrt(2.0) * jnp.cos(m * alphas))
    sha = jnp.stack(cols, axis=-1)

    # beta (Legendre-like) basis shb: [2*lmax+1, res_beta, (lmax+1)^2], deterministic synthetic
    shb = 0.1 * jax.random.normal(k_shb, (n_m, res_beta, n_coeff), dtype=jnp.float32)
    # l=0 coefficient couples only to m=0 and is constant over beta (Y_00 = 1/sqrt(4*pi))
    shb = shb.at[:, :, 0].set(0.0)
    shb = shb.at[lmax, :, 0].set(1.0 / math.sqrt(4.0 * math.pi))

    # coefficients: dominant positive l=0 part keeps the target grid strictly positive
    x = 0.05 * jax.random.normal(k_x, (Z, n_coeff), dtype=jnp.float32)
    x = x.at[:, 0].set(4.0 + 0.1 * jax.random.normal(k_x0, (Z,), dtype=jnp.float32))
    t = 0.05 * jax.random.normal(k_t, (Z, n_coeff), dtype=jnp.float32)
    t = t.at[:, 0].set(4.0)

    # "Module init": build the constant coeff->grid matrix + lane-pad bias once.
    w_padded, bias, g_actual = build_coeff_to_grid_matrix(shb, sha)
    w_padded, bias = jax.block_until_ready((w_padded, bias))

    loss = weighted_grid_loss(x, t, w_padded, bias, g_actual=g_actual)
    loss = jax.block_until_ready(loss)

    # pure-JAX reference: the two ToS2Grid einsums + weighted MSE mean (f32, exact divide)
    def ref(xc, tc):
        xg = jnp.einsum('am,mbi,zi->zba', sha, shb, xc, precision='highest')
        tg = jnp.einsum('am,mbi,zi->zba', sha, shb, tc, precision='highest')
        return jnp.mean((xg - tg) ** 2 / tg)

    ref_loss = jax.block_until_ready(ref(x, t))
    assert bool(jnp.isfinite(loss)), loss
    assert jnp.allclose(loss, ref_loss, rtol=1e-1, atol=1e-6), (loss, ref_loss)

    print("KERNEL_OK")
</pallas_src>

<mosaic_0001>
module attributes {stable_mosaic.version = 11 : i64} {
  func.func @kernel(%arg0: i32, %arg1: i32, %arg2: memref<2x16xf32, #tpu.memory_space<vmem>>, %arg3: memref<2x16xf32, #tpu.memory_space<vmem>>, %arg4: memref<16x5120xbf16, #tpu.memory_space<vmem>>, %arg5: memref<1x5120xf32, #tpu.memory_space<vmem>>, %arg6: memref<1x1xf32, #tpu.memory_space<smem>>, %arg7: memref<2x5120xf32, #tpu.memory_space<vmem>>) attributes {dimension_semantics = [#tpu.dimension_semantics<arbitrary>, #tpu.dimension_semantics<arbitrary>], iteration_bounds = array<i64: 1, 1>, scalar_prefetch = 0 : i64, scratch_operands = 1 : i64, tpu.core_type = #tpu.core_type<tc>, window_params = [{transform_indices = @transform_0, window_bounds = array<i64: 2, 16>}, {transform_indices = @transform_1, window_bounds = array<i64: 2, 16>}, {transform_indices = @transform_2, window_bounds = array<i64: 16, 5120>}, {transform_indices = @transform_3, window_bounds = array<i64: 1, 5120>}, {transform_indices = @transform_4, window_bounds = array<i64: 1, 1>}]} {
    %c0_i32 = arith.constant 0 : i32
    %0 = arith.cmpi eq, %arg0, %c0_i32 : i32
    %c0_i32_0 = arith.constant 0 : i32
    %1 = arith.cmpi eq, %arg1, %c0_i32_0 : i32
    %2 = arith.andi %0, %1 : i1
    %3 = arith.extui %2 : i1 to i32
    %c0_i32_1 = arith.constant 0 : i32
    %4 = arith.cmpi ne, %3, %c0_i32_1 : i32
    scf.if %4 {
      %cst_17 = arith.constant 0.000000e+00 : f32
      %c0_18 = arith.constant 0 : index
      %c0_19 = arith.constant 0 : index
      %27 = memref.load %arg6[%c0_18, %c0_19] : memref<1x1xf32, #tpu.memory_space<smem>>
      memref.store %cst_17, %arg6[%c0_18, %c0_19] : memref<1x1xf32, #tpu.memory_space<smem>>
      %cst_20 = arith.constant 0.000000e+00 : f32
      %28 = vector.broadcast %cst_20 : f32 to vector<2x5120xf32>
      %c0_21 = arith.constant 0 : index
      %c0_22 = arith.constant 0 : index
      %29 = vector.load %arg7[%c0_21, %c0_22] : memref<2x5120xf32, #tpu.memory_space<vmem>>, vector<2x5120xf32>
      tpu.vector_store %arg7[%c0_21, %c0_22], %28 {strides = array<i32>} : memref<2x5120xf32, #tpu.memory_space<vmem>>, vector<2x5120xf32>,
    } else {
    }
    %c0 = arith.constant 0 : index
    %c0_2 = arith.constant 0 : index
    %5 = vector.load %arg2[%c0, %c0_2] : memref<2x16xf32, #tpu.memory_space<vmem>>, vector<2x16xf32>
    %c0_3 = arith.constant 0 : index
    %c0_4 = arith.constant 0 : index
    %6 = vector.load %arg3[%c0_3, %c0_4] : memref<2x16xf32, #tpu.memory_space<vmem>>, vector<2x16xf32>
    %c0_5 = arith.constant 0 : index
    %c0_6 = arith.constant 0 : index
    %7 = vector.load %arg4[%c0_5, %c0_6] : memref<16x5120xbf16, #tpu.memory_space<vmem>>, vector<16x5120xbf16>
    %8 = arith.subf %5, %6 : vector<2x16xf32>
    %9 = arith.truncf %8 : vector<2x16xf32> to vector<2x16xbf16>
    %10 = arith.truncf %6 : vector<2x16xf32> to vector<2x16xbf16>
    %cst = arith.constant dense<0.000000e+00> : vector<2x5120xf32>
    %11 = tpu.matmul %9, %7, %cst {dimension_numbers = #tpu.dot_dimension_numbers<[1], [0], [0], [1], [0, 0, 1, 1], [], []>} : vector<2x16xbf16>, vector<16x5120xbf16>, vector<2x5120xf32> -> vector<2x5120xf32>
    %cst_7 = arith.constant dense<0.000000e+00> : vector<2x5120xf32>
    %12 = tpu.matmul %10, %7, %cst_7 {dimension_numbers = #tpu.dot_dimension_numbers<[1], [0], [0], [1], [0, 0, 1, 1], [], []>} : vector<2x16xbf16>, vector<16x5120xbf16>, vector<2x5120xf32> -> vector<2x5120xf32>
    %c0_8 = arith.constant 0 : index
    %c0_9 = arith.constant 0 : index
    %13 = vector.load %arg5[%c0_8, %c0_9] : memref<1x5120xf32, #tpu.memory_space<vmem>>, vector<1x5120xf32>
    %14 = vector.broadcast %13 : vector<1x5120xf32> to vector<2x5120xf32>
    %15 = arith.addf %12, %14 : vector<2x5120xf32>
    %c0_10 = arith.constant 0 : index
    %c0_11 = arith.constant 0 : index
    %16 = vector.load %arg7[%c0_10, %c0_11] : memref<2x5120xf32, #tpu.memory_space<vmem>>, vector<2x5120xf32>
    %17 = arith.mulf %11, %11 : vector<2x5120xf32>
    %18 = tpu.reciprocal %15 {approx = true} : vector<2x5120xf32> -> vector<2x5120xf32>
    %19 = arith.mulf %17, %18 : vector<2x5120xf32>
    %20 = arith.addf %16, %19 : vector<2x5120xf32>
    %c0_12 = arith.constant 0 : index
    %c0_13 = arith.constant 0 : index
    %21 = vector.load %arg7[%c0_12, %c0_13] : memref<2x5120xf32, #tpu.memory_space<vmem>>, vector<2x5120xf32>
    tpu.vector_store %arg7[%c0_12, %c0_13], %20 {strides = array<i32>} : memref<2x5120xf32, #tpu.memory_space<vmem>>, vector<2x5120xf32>,
    %c0_i32_14 = arith.constant 0 : i32
    %22 = arith.cmpi eq, %arg0, %c0_i32_14 : i32
    %c0_i32_15 = arith.constant 0 : i32
    %23 = arith.cmpi eq, %arg1, %c0_i32_15 : i32
    %24 = arith.andi %22, %23 : i1
    %25 = arith.extui %24 : i1 to i32
    %c0_i32_16 = arith.constant 0 : i32
    %26 = arith.cmpi ne, %25, %c0_i32_16 : i32
    scf.if %26 {
      %c0_17 = arith.constant 0 : index
      %c0_18 = arith.constant 0 : index
      %27 = vector.load %arg7[%c0_17, %c0_18] : memref<2x5120xf32, #tpu.memory_space<vmem>>, vector<2x5120xf32>
      %28 = vector.shape_cast %27 : vector<2x5120xf32> to vector<1x2x5120xf32>
      %cst_19 = arith.constant dense<0.000000e+00> : vector<1xf32>
      %29 = vector.multi_reduction <add>, %28, %cst_19 [1, 2] : vector<1x2x5120xf32> to vector<1xf32>
      %30 = vector.shape_cast %29 : vector<1xf32> to vector<1x1x1xf32>
      %31 = vector.extract %30[0, 0, 0] : f32 from vector<1x1x1xf32>
      %cst_20 = arith.constant 9.80392142E-5 : f32
      %32 = arith.mulf %31, %cst_20 : f32
      %c0_21 = arith.constant 0 : index
      %c0_22 = arith.constant 0 : index
      %33 = memref.load %arg6[%c0_21, %c0_22] : memref<1x1xf32, #tpu.memory_space<smem>>
      memref.store %32, %arg6[%c0_21, %c0_22] : memref<1x1xf32, #tpu.memory_space<smem>>
    } else {
    }
    return
  }
  func.func @transform_0(%arg0: i32, %arg1: i32) -> (i32, i32) {
    %c0_i32 = arith.constant 0 : i32
    %c0_i32_0 = arith.constant 0 : i32
    return %arg0, %c0_i32 : i32, i32
  }
  func.func @transform_1(%arg0: i32, %arg1: i32) -> (i32, i32) {
    %c0_i32 = arith.constant 0 : i32
    %c0_i32_0 = arith.constant 0 : i32
    return %arg0, %c0_i32 : i32, i32
  }
  func.func @transform_2(%arg0: i32, %arg1: i32) -> (i32, i32) {
    %c0_i32 = arith.constant 0 : i32
    %c0_i32_0 = arith.constant 0 : i32
    return %c0_i32, %arg1 : i32, i32
  }
  func.func @transform_3(%arg0: i32, %arg1: i32) -> (i32, i32) {
    %c0_i32 = arith.constant 0 : i32
    %c0_i32_0 = arith.constant 0 : i32
    return %c0_i32, %arg1 : i32, i32
  }
  func.func @transform_4(%arg0: i32, %arg1: i32) -> (i32, i32) {
    %c0_i32 = arith.constant 0 : i32
    %c0_i32_0 = arith.constant 0 : i32
    %c0_i32_1 = arith.constant 0 : i32
    return %c0_i32, %c0_i32_0 : i32, i32
  }
}

</mosaic_0001>

<bundles_post_ra>
// kernel: weighted_grid_loss.1
= control target key start
LH: loop header
LB: loop body
LE: loop exit
PB: predicated region body
PF: predicated region fallthrough
CT: control target
= control target key end

     0   :  { %9 = vsyncpa [#allocation4], 0  ;;  %s4001_s0 = inlined_call_operand.hbm [shape: f32[2,16], index: 0, kind: input, shape index: {}]   ;;  %s4002_s1 = inlined_call_operand.vmem [shape: f32[2,16], index: 1, kind: input, shape index: {}]   ;;  %s4003_s2 = inlined_call_operand.hbm [shape: bf16[16,5120], index: 2, kind: input, shape index: {}]   ;;  %s4004_s3 = inlined_call_operand.hbm [shape: f32[1,5120], index: 3, kind: input, shape index: {}]   ;;  %s4005_s4 = inlined_call_operand.hbm [shape: f32[1,1], index: 4, kind: output, shape index: {}]  }
   0x1   :  { %10 = vsyncpa [#allocation7], 0 }
   0x2   :  { %11 = vsyncpa [#allocation5], 0  ;;  %s3148_s15 = smov [#allocation6]   ;;  %s3066_s19 = scalar_lea.hbm %s4003_s2, 5120 }
   0x3   :  { %s29_s16 = sshll.u32 %s3148_s15, 4  ;;  %p3067_p0 = scmp.ne.s32.totalorder %s4003_s2, %s3066_s19  ;;  %s30_s16 = int_to_ptr.vmem [resolvable:$true] %s29_s16 }
   0x4   :  { %p3070_p1 = scmp.lt.u32.totalorder %s3066_s19, %s4003_s2 }
   0x6   :  { %p3072_p2 = pnand %p3070_p1, %p3067_p0 }
   0x8   :  { %3075 = shalt.err (!%p3072_p2)
}
   0x9   :  { %s3076_s24 = scalar_lea.vmem %s30_s16, 5120  ;;  %p3081_p4 = scmp.lt.s32.totalorder %s30_s16, %s30_s16 }
   0xa   :  { %p3077_p3 = scmp.ne.s32.totalorder %s30_s16, %s3076_s24  ;;  %p3082_p5 = scmp.lt.s32.totalorder %s3076_s24, %s3076_s24 }
   0xc   :  { %p3083_p6 = por %p3082_p5, %p3081_p4 }
   0xe   :  { %p3084_p7 = pnand %p3083_p6, %p3077_p3 }
  0x10   :  { %3087 = shalt.err (!%p3084_p7)
}
  0x11   :  { %s3149_s25 = smov 2560   ;;  %s3150_s26 = smov 160  }
  0x12   :  { %35 = dma.hbm_to_vmem [thread:$0]  %s4003_s2, 5120, %s30_s16, [#allocation7], %s3149_s25, %s3149_s25, %s3150_s26  }
  0x13   :  { %s3151_s29 = smov [#allocation3]   ;;  %s3152_s5 = smov [#allocation8]  }
  0x14   :  { %s18_s30 = sshll.u32 %s3151_s29, 4  ;;  %s42_s6 = sshll.u32 %s3152_s5, 4  ;;  %s19_s30 = int_to_ptr.vmem [resolvable:$true] %s18_s30  ;;  %s43_s6 = int_to_ptr.vmem [resolvable:$true] %s42_s6 }
  0x15   :  { %s3088_s9 = scalar_lea.hbm %s4001_s0, 32 }
  0x16   :  { %p3089_p8 = scmp.ne.s32.totalorder %s4001_s0, %s3088_s9  ;;  %p3092_p9 = scmp.lt.u32.totalorder %s3088_s9, %s4001_s0 }
  0x18   :  { %p3094_p10 = pnand %p3092_p9, %p3089_p8 }
  0x1a   :  { %3097 = shalt.err (!%p3094_p10)
}
  0x1b   :  { %s3098_s2 = scalar_lea.vmem %s19_s30, 32  ;;  %p3103_p12 = scmp.lt.s32.totalorder %s19_s30, %s19_s30 }
  0x1c   :  { %p3099_p11 = scmp.ne.s32.totalorder %s19_s30, %s3098_s2  ;;  %p3104_p13 = scmp.lt.s32.totalorder %s3098_s2, %s3098_s2 }
  0x1e   :  { %p3105_p0 = por %p3104_p13, %p3103_p12 }
  0x20   :  { %p3106_p1 = pnand %p3105_p0, %p3099_p11 }
  0x22   :  { %3109 = shalt.err (!%p3106_p1)
}
  0x23   :  { %21 = dma.hbm_to_vmem [thread:$0]  %s4001_s0, 32, %s19_s30, [#allocation4]  }
  0x24   :  { %s3110_s18 = scalar_lea.hbm %s4004_s3, 640 }
  0x25   :  { %p3111_p2 = scmp.ne.s32.totalorder %s4004_s3, %s3110_s18  ;;  %p3114_p3 = scmp.lt.u32.totalorder %s3110_s18, %s4004_s3 }
  0x27   :  { %p3116_p4 = pnand %p3114_p3, %p3111_p2 }
  0x29   :  { %3119 = shalt.err (!%p3116_p4)
}
  0x2a   :  { %s3120_s23 = scalar_lea.vmem %s43_s6, 640  ;;  %p3125_p6 = scmp.lt.s32.totalorder %s43_s6, %s43_s6 }
  0x2b   :  { %p3121_p5 = scmp.ne.s32.totalorder %s43_s6, %s3120_s23  ;;  %p3126_p7 = scmp.lt.s32.totalorder %s3120_s23, %s3120_s23 }
  0x2d   :  { %p3127_p8 = por %p3126_p7, %p3125_p6 }
  0x2f   :  { %p3128_p9 = pnand %p3127_p8, %p3121_p5 }
  0x31   :  { %3131 = shalt.err (!%p3128_p9)
}
  0x32   :  { %45 = dma.hbm_to_vmem [thread:$0]  %s4004_s3, 640, %s43_s6, [#allocation7]  }
  0x33   :  { %3142 = dma.done.wait [#allocation4], 32  }
  0x34   :  { %3143 = vsyncadd [#allocation4], 4294967264 }
  0x35   :  { %3144 = dma.done.wait [#allocation7], 5760  }
  0x36   :  { %3145 = vsyncadd [#allocation7], 4294961536  ;;  %v3153_v0 = vmov 0   ;;  %v76_v1 = vld [vmem:[#allocation6] sm:$0xff]  ;;  %v77_v3 = vld [vmem:[#allocation6 + $0x8] sm:$0xff]  ;;  %vm319_vm0 = vcmask 130048  }
  0x37   :  { %355 = vmatprep.mubr.bf16.mxu0 %v3153_v0  ;;  %396 = vmatprep.mubr.bf16.mxu1 %v3153_v0  ;;  %v96_v2 = vld [vmem:[#allocation6 + $0xa0] sm:$0xff]  ;;  %v97_v5 = vld [vmem:[#allocation6 + $0xa8] sm:$0xff]  ;;  %v74_v7 = vld [vmem:[#allocation3] sm:$0x3]  ;;  %vm2778_vm1 = vcmask 1041408   ;;  %s3132_s29 = scalar_lea.hbm %s4005_s4, 16 }
  0x38   :  { %v3219_v4 = vcombine.high %v76_v1, %v96_v2  ;;  %v3221_v6 = vcombine.low %v76_v1, %v96_v2  ;;  %v3226_v8 = vld [vmem:[%s4002_s1] sm:$0x3]  ;;  %v3228_v9 = vcombine.high %v77_v3, %v97_v5  ;;  %v3230_v10 = vcombine.low %v77_v3, %v97_v5  ;;  %v78_v12 = vld [vmem:[#allocation6 + $0x10] sm:$0xff]  ;;  %v80_v17 = vld [vmem:[#allocation6 + $0x20] sm:$0xff]  ;;  %p3133_p10 = scmp.ne.s32.totalorder %s4005_s4, %s3132_s29  ;;  %p3136_p11 = scmp.lt.u32.totalorder %s3132_s29, %s4005_s4 }
  0x39   :  { %v116_v11 = vsub.f32 %v74_v7, %v3226_v8  ;;  %v98_v13 = vld [vmem:[#allocation6 + $0xb0] sm:$0xff]  ;;  %v79_v14 = vld [vmem:[#allocation6 + $0x18] sm:$0xff]  ;;  %v100_v18 = vld [vmem:[#allocation6 + $0xc0] sm:$0xff] }
  0x3a   :  { %323 = vmatprep.subr.bf16.mxu0 %v3219_v4  ;;  %v3234_v15 = vcombine.high %v78_v12, %v98_v13  ;;  %v99_v16 = vld [vmem:[#allocation6 + $0xb8] sm:$0xff]  ;;  %364 = vmatprep.subr.bf16.mxu1 %v3228_v9  ;;  %v3240_v20 = vcombine.low %v78_v12, %v98_v13  ;;  %v81_v22 = vld [vmem:[#allocation6 + $0x28] sm:$0xff]  ;;  %v3249_v25 = vcombine.high %v80_v17, %v100_v18  ;;  %v82_v27 = vld [vmem:[#allocation6 + $0x30] sm:$0xff]  ;;  %p3138_p12 = pnand %p3136_p11, %p3133_p10 }
  0x3b   :  { %324 = vmatpush1.bf16.msra.mxu0 %v3221_v6  ;;  %v3238_v19 = vpack.c.bf16 %v116_v11, %v116_v11  ;;  %v3242_v21 = vcombine.high %v79_v14, %v99_v16  ;;  %v101_v23 = vld [vmem:[#allocation6 + $0xc8] sm:$0xff]  ;;  %365 = vmatpush1.bf16.msra.mxu1 %v3230_v10  ;;  %v3246_v24 = vcombine.low %v79_v14, %v99_v16  ;;  %v102_v28 = vld [vmem:[#allocation6 + $0xd0] sm:$0xff]  ;;  %v83_v30 = vld [vmem:[#allocation6 + $0x38] sm:$0xff] }
  0x3c   :  { %405 = vmatprep.subr.bf16.mxu0 %v3234_v15  ;;  %v3253_v26 = vcombine.high %v81_v22, %v101_v23  ;;  %v3263_v29 = vcombine.low %v80_v17, %v100_v18  ;;  %v103_v31 = vld [vmem:[#allocation6 + $0xd8] sm:$0xff]  ;;  %v3265_v32 = vcombine.low %v81_v22, %v101_v23  ;;  %v3267_v33 = vcombine.high %v82_v27, %v102_v28  ;;  %v84_v35 = vld [vmem:[#allocation6 + $0x40] sm:$0xff]  ;;  %v85_v38 = vld [vmem:[#allocation6 + $0x48] sm:$0xff] }
  0x3d   :  { %446 = vmatprep.subr.bf16.mxu1 %v3242_v21  ;;  %v3271_v34 = vcombine.high %v83_v30, %v103_v31  ;;  %v104_v36 = vld [vmem:[#allocation6 + $0xe0] sm:$0xff]  ;;  %v3281_v37 = vcombine.low %v82_v27, %v102_v28  ;;  %v105_v39 = vld [vmem:[#allocation6 + $0xe8] sm:$0xff]  ;;  %v3283_v40 = vcombine.low %v83_v30, %v103_v31  ;;  %v86_v43 = vld [vmem:[#allocation6 + $0x50] sm:$0xff] }
  0x3e   :  { %2925 = vmatmul.mubr.msk.bf16.vlgmr.msra.gmra.mrb[0].mxu0 %vm319_vm0, %v3238_v19  ;;  %2926 = vmatmul.mubr.msk.bf16.vlgmr.msra.gmra.mrb[0].mxu1 %vm319_vm0, %v3238_v19  ;;  %v3285_v41 = vcombine.high %v84_v35, %v104_v36  ;;  %v3289_v42 = vcombine.high %v85_v38, %v105_v39  ;;  %v106_v44 = vld [vmem:[#allocation6 + $0xf0] sm:$0xff]  ;;  %v3299_v45 = vcombine.low %v84_v35, %v104_v36  ;;  %v87_v46 = vld [vmem:[#allocation6 + $0x58] sm:$0xff]  ;;  %v88_v51 = vld [vmem:[#allocation6 + $0x60] sm:$0xff] }
  0x3f   :  { %406 = vmatpush1.bf16.msra.mxu0 %v3240_v20  ;;  %447 = vmatpush1.bf16.msra.mxu1 %v3246_v24  ;;  %v107_v47 = vld [vmem:[#allocation6 + $0xf8] sm:$0xff]  ;;  %v3301_v48 = vcombine.low %v85_v38, %v105_v39  ;;  %v3303_v49 = vcombine.high %v86_v43, %v106_v44  ;;  %v108_v52 = vld [vmem:[#allocation6 + $0x100] sm:$0xff]  ;;  %v3317_v53 = vcombine.low %v86_v43, %v106_v44  ;;  %v89_v54 = vld [vmem:[#allocation6 + $0x68] sm:$0xff] }
  0x40   :  { %437 = vmatprep.mubr.bf16.mxu0 %v3153_v0  ;;  %478 = vmatprep.mubr.bf16.mxu1 %v3153_v0  ;;  %v3307_v50 = vcombine.high %v87_v46, %v107_v47  ;;  %v109_v55 = vld [vmem:[#allocation6 + $0x108] sm:$0xff]  ;;  %v3319_v56 = vcombine.low %v87_v46, %v107_v47  ;;  %v3321_v57 = vcombine.high %v88_v51, %v108_v52  ;;  %v90_v59 = vld [vmem:[#allocation6 + $0x70] sm:$0xff]  ;;  %v91_v62 = vld [vmem:[#allocation6 + $0x78] sm:$0xff] }
  0x41   :  { %487 = vmatprep.subr.bf16.mxu0 %v3249_v25  ;;  %528 = vmatprep.subr.bf16.mxu1 %v3253_v26  ;;  %v3325_v58 = vcombine.high %v89_v54, %v109_v55  ;;  %v110_v60 = vld [vmem:[#allocation6 + $0x110] sm:$0xff]  ;;  %v3335_v61 = vcombine.low %v88_v51, %v108_v52  ;;  %v111_v63 = vld [vmem:[#allocation6 + $0x118] sm:$0xff]  ;;  %v3337_v1 = vcombine.low %v89_v54, %v109_v55  ;;  %v92_v5 = vld [vmem:[#allocation6 + $0x80] sm:$0xff] }
  0x42   :  { %v3339_v2 = vcombine.high %v90_v59, %v110_v60  ;;  %v3343_v3 = vcombine.high %v91_v62, %v111_v63  ;;  %v112_v7 = vld [vmem:[#allocation6 + $0x120] sm:$0xff]  ;;  %v3353_v11 = vcombine.low %v90_v59, %v110_v60  ;;  %v93_v12 = vld [vmem:[#allocation6 + $0x88] sm:$0xff]  ;;  %v3355_v14 = vcombine.low %v91_v62, %v111_v63  ;;  %v94_v18 = vld [vmem:[#allocation6 + $0x90] sm:$0xff] }
  0x43   :  { %v113_v13 = vld [vmem:[#allocation6 + $0x128] sm:$0xff]  ;;  %v3357_v16 = vcombine.high %v92_v5, %v112_v7  ;;  %v114_v22 = vld [vmem:[#allocation6 + $0x130] sm:$0xff]  ;;  %v3371_v23 = vcombine.low %v92_v5, %v112_v7  ;;  %v95_v27 = vld [vmem:[#allocation6 + $0x98] sm:$0xff] }
  0x44   :  { %v3361_v17 = vcombine.high %v93_v12, %v113_v13  ;;  %v115_v28 = vld [vmem:[#allocation6 + $0x138] sm:$0xff]  ;;  %v3373_v30 = vcombine.low %v93_v12, %v113_v13  ;;  %v3375_v31 = vcombine.high %v94_v18, %v114_v22  ;;  %v3389_v36 = vcombine.low %v94_v18, %v114_v22 }
  0x45   :  { %v3379_v35 = vcombine.high %v95_v27, %v115_v28  ;;  %v3391_v38 = vcombine.low %v95_v27, %v115_v28 }
  0x46   :  { %2927 = vmatmul.mubr.msk.bf16.vlgmr.msra.gmra.mrb[4].mxu0 %vm319_vm0, %v3238_v19  ;;  %2928 = vmatmul.mubr.msk.bf16.vlgmr.msra.gmra.mrb[4].mxu1 %vm319_vm0, %v3238_v19 }
  0x47   :  { %488 = vmatpush1.bf16.msra.mxu0 %v3263_v29  ;;  %529 = vmatpush1.bf16.msra.mxu1 %v3265_v32 }
  0x48   :  { %519 = vmatprep.mubr.bf16.mxu0 %v3153_v0  ;;  %560 = vmatprep.mubr.bf16.mxu1 %v3153_v0 }
  0x49   :  { %569 = vmatprep.subr.bf16.mxu0 %v3267_v33  ;;  %610 = vmatprep.subr.bf16.mxu1 %v3271_v34 }
  0x4e   :  { %2929 = vmatmul.mubr.msk.bf16.vlgmr.msra.gmra.mrb[8].mxu0 %vm319_vm0, %v3238_v19  ;;  %2930 = vmatmul.mubr.msk.bf16.vlgmr.msra.gmra.mrb[8].mxu1 %vm319_vm0, %v3238_v19 }
  0x4f   :  { %570 = vmatpush1.bf16.msra.mxu0 %v3281_v37  ;;  %611 = vmatpush1.bf16.msra.mxu1 %v3283_v40 }
  0x50   :  { %601 = vmatprep.mubr.bf16.mxu0 %v3153_v0  ;;  %642 = vmatprep.mubr.bf16.mxu1 %v3153_v0 }
  0x51   :  { %651 = vmatprep.subr.bf16.mxu0 %v3285_v41  ;;  %692 = vmatprep.subr.bf16.mxu1 %v3289_v42 }
  0x56   :  { %2931 = vmatmul.mubr.msk.bf16.vlgmr.msra.gmra.mrb[12].mxu0 %vm319_vm0, %v3238_v19  ;;  %2932 = vmatmul.mubr.msk.bf16.vlgmr.msra.gmra.mrb[12].mxu1 %vm319_vm0, %v3238_v19 }
  0x57   :  { %652 = vmatpush1.bf16.msra.mxu0 %v3299_v45  ;;  %693 = vmatpush1.bf16.msra.mxu1 %v3301_v48 }
  0x58   :  { %683 = vmatprep.mubr.bf16.mxu0 %v3153_v0  ;;  %724 = vmatprep.mubr.bf16.mxu1 %v3153_v0 }
  0x59   :  { %733 = vmatprep.subr.bf16.mxu0 %v3303_v49  ;;  %774 = vmatprep.subr.bf16.mxu1 %v3307_v50 }
  0x5e   :  { %2933 = vmatmul.mubr.msk.bf16.vlgmr.msra.gmra.mrb[16].mxu0 %vm319_vm0, %v3238_v19  ;;  %2934 = vmatmul.mubr.msk.bf16.vlgmr.msra.gmra.mrb[16].mxu1 %vm319_vm0, %v3238_v19 }
  0x5f   :  { %734 = vmatpush1.bf16.msra.mxu0 %v3317_v53  ;;  %775 = vmatpush1.bf16.msra.mxu1 %v3319_v56 }
  0x60   :  { %765 = vmatprep.mubr.bf16.mxu0 %v3153_v0  ;;  %806 = vmatprep.mubr.bf16.mxu1 %v3153_v0 }
  0x61   :  { %815 = vmatprep.subr.bf16.mxu0 %v3321_v57  ;;  %856 = vmatprep.subr.bf16.mxu1 %v3325_v58 }
  0x66   :  { %2935 = vmatmul.mubr.msk.bf16.vlgmr.msra.gmra.mrb[20].mxu0 %vm319_vm0, %v3238_v19  ;;  %2936 = vmatmul.mubr.msk.bf16.vlgmr.msra.gmra.mrb[20].mxu1 %vm319_vm0, %v3238_v19 }
  0x67   :  { %816 = vmatpush1.bf16.msra.mxu0 %v3335_v61  ;;  %857 = vmatpush1.bf16.msra.mxu1 %v3337_v1 }
  0x68   :  { %847 = vmatprep.mubr.bf16.mxu0 %v3153_v0  ;;  %888 = vmatprep.mubr.bf16.mxu1 %v3153_v0 }
  0x69   :  { %897 = vmatprep.subr.bf16.mxu0 %v3339_v2  ;;  %938 = vmatprep.subr.bf16.mxu1 %v3343_v3 }
  0x6e   :  { %2937 = vmatmul.mubr.msk.bf16.vlgmr.msra.gmra.mrb[24].mxu0 %vm319_vm0, %v3238_v19  ;;  %2938 = vmatmul.mubr.msk.bf16.vlgmr.msra.gmra.mrb[24].mxu1 %vm319_vm0, %v3238_v19 }
  0x6f   :  { %898 = vmatpush1.bf16.msra.mxu0 %v3353_v11  ;;  %939 = vmatpush1.bf16.msra.mxu1 %v3355_v14 }
  0x70   :  { %929 = vmatprep.mubr.bf16.mxu0 %v3153_v0  ;;  %970 = vmatprep.mubr.bf16.mxu1 %v3153_v0 }
  0x71   :  { %979 = vmatprep.subr.bf16.mxu0 %v3357_v16  ;;  %1020 = vmatprep.subr.bf16.mxu1 %v3361_v17 }
  0x76   :  { %2939 = vmatmul.mubr.msk.bf16.vlgmr.msra.gmra.mrb[28].mxu0 %vm319_vm0, %v3238_v19  ;;  %2940 = vmatmul.mubr.msk.bf16.vlgmr.msra.gmra.mrb[28].mxu1 %vm319_vm0, %v3238_v19 }
  0x77   :  { %980 = vmatpush1.bf16.msra.mxu0 %v3371_v23  ;;  %1021 = vmatpush1.bf16.msra.mxu1 %v3373_v30 }
  0x78   :  { %1011 = vmatprep.mubr.bf16.mxu0 %v3153_v0  ;;  %1052 = vmatprep.mubr.bf16.mxu1 %v3153_v0 }
  0x79   :  { %1061 = vmatprep.subr.bf16.mxu0 %v3375_v31  ;;  %1102 = vmatprep.subr.bf16.mxu1 %v3379_v35 }
  0x7e   :  { %2941 = vmatmul.mubr.msk.bf16.vlgmr.msra.gmra.mrb[32].mxu0 %vm319_vm0, %v3238_v19  ;;  %2942 = vmatmul.mubr.msk.bf16.vlgmr.msra.gmra.mrb[32].mxu1 %vm319_vm0, %v3238_v19 }
  0x7f   :  { %1062 = vmatpush1.bf16.msra.mxu0 %v3389_v36  ;;  %1103 = vmatpush1.bf16.msra.mxu1 %v3391_v38 }
  0x80   :  { %1093 = vmatprep.mubr.bf16.mxu0 %v3153_v0  ;;  %1134 = vmatprep.mubr.bf16.mxu1 %v3153_v0 }
  0x81   :  { %1356 = vmatprep.subr.bf16.mxu0 %v3219_v4  ;;  %1397 = vmatprep.subr.bf16.mxu1 %v3228_v9  ;;  %v3414_v4 = vpack.c.bf16 %v3226_v8, %v3226_v8 }
  0x86   :  { %2943 = vmatmul.mubr.msk.bf16.vlgmr.msra.gmra.mrb[36].mxu0 %vm319_vm0, %v3238_v19  ;;  %2944 = vmatmul.mubr.msk.bf16.vlgmr.msra.gmra.mrb[36].mxu1 %vm319_vm0, %v3238_v19 }
  0x87   :  { %1357 = vmatpush1.bf16.msra.mxu0 %v3221_v6  ;;  %1398 = vmatpush1.bf16.msra.mxu1 %v3230_v10 }
  0x88   :  { %1388 = vmatprep.mubr.bf16.mxu0 %v3153_v0  ;;  %1429 = vmatprep.mubr.bf16.mxu1 %v3153_v0 }
  0x89   :  { %1438 = vmatprep.subr.bf16.mxu0 %v3234_v15  ;;  %1479 = vmatprep.subr.bf16.mxu1 %v3242_v21 }
  0x8e   :  { %2945 = vmatmul.mubr.msk.bf16.vlgmr.msra.gmra.mrb[40].mxu0 %vm319_vm0, %v3414_v4  ;;  %2946 = vmatmul.mubr.msk.bf16.vlgmr.msra.gmra.mrb[40].mxu1 %vm319_vm0, %v3414_v4 }
  0x8f   :  { %1439 = vmatpush1.bf16.msra.mxu0 %v3240_v20  ;;  %1480 = vmatpush1.bf16.msra.mxu1 %v3246_v24 }
  0x90   :  { %1470 = vmatprep.mubr.bf16.mxu0 %v3153_v0  ;;  %1511 = vmatprep.mubr.bf16.mxu1 %v3153_v0 }
  0x91   :  { %1520 = vmatprep.subr.bf16.mxu0 %v3249_v25  ;;  %1561 = vmatprep.subr.bf16.mxu1 %v3253_v26 }
  0x96   :  { %2947 = vmatmul.mubr.msk.bf16.vlgmr.msra.gmra.mrb[44].mxu0 %vm319_vm0, %v3414_v4  ;;  %2948 = vmatmul.mubr.msk.bf16.vlgmr.msra.gmra.mrb[44].mxu1 %vm319_vm0, %v3414_v4 }
  0x97   :  { %1521 = vmatpush1.bf16.msra.mxu0 %v3263_v29  ;;  %1562 = vmatpush1.bf16.msra.mxu1 %v3265_v32 }
  0x98   :  { %1552 = vmatprep.mubr.bf16.mxu0 %v3153_v0  ;;  %1593 = vmatprep.mubr.bf16.mxu1 %v3153_v0 }
  0x99   :  { %1602 = vmatprep.subr.bf16.mxu0 %v3267_v33  ;;  %1643 = vmatprep.subr.bf16.mxu1 %v3271_v34 }
  0x9e   :  { %2949 = vmatmul.mubr.msk.bf16.vlgmr.msra.gmra.mrb[48].mxu0 %vm319_vm0, %v3414_v4  ;;  %2950 = vmatmul.mubr.msk.bf16.vlgmr.msra.gmra.mrb[48].mxu1 %vm319_vm0, %v3414_v4 }
  0x9f   :  { %1603 = vmatpush1.bf16.msra.mxu0 %v3281_v37  ;;  %1644 = vmatpush1.bf16.msra.mxu1 %v3283_v40 }
  0xa0   :  { %1634 = vmatprep.mubr.bf16.mxu0 %v3153_v0  ;;  %1675 = vmatprep.mubr.bf16.mxu1 %v3153_v0 }
  0xa1   :  { %1684 = vmatprep.subr.bf16.mxu0 %v3285_v41  ;;  %1725 = vmatprep.subr.bf16.mxu1 %v3289_v42 }
  0xa6   :  { %2951 = vmatmul.mubr.msk.bf16.vlgmr.msra.gmra.mrb[52].mxu0 %vm319_vm0, %v3414_v4  ;;  %2952 = vmatmul.mubr.msk.bf16.vlgmr.msra.gmra.mrb[52].mxu1 %vm319_vm0, %v3414_v4 }
  0xa7   :  { %1685 = vmatpush1.bf16.msra.mxu0 %v3299_v45  ;;  %1726 = vmatpush1.bf16.msra.mxu1 %v3301_v48 }
  0xa8   :  { %1716 = vmatprep.mubr.bf16.mxu0 %v3153_v0  ;;  %1757 = vmatprep.mubr.bf16.mxu1 %v3153_v0 }
  0xa9   :  { %1766 = vmatprep.subr.bf16.mxu0 %v3303_v49  ;;  %1807 = vmatprep.subr.bf16.mxu1 %v3307_v50 }
  0xae   :  { %2953 = vmatmul.mubr.msk.bf16.vlgmr.msra.gmra.mrb[56].mxu0 %vm319_vm0, %v3414_v4  ;;  %2954 = vmatmul.mubr.msk.bf16.vlgmr.msra.gmra.mrb[56].mxu1 %vm319_vm0, %v3414_v4 }
  0xaf   :  { %1767 = vmatpush1.bf16.msra.mxu0 %v3317_v53  ;;  %1808 = vmatpush1.bf16.msra.mxu1 %v3319_v56 }
  0xb0   :  { %1798 = vmatprep.mubr.bf16.mxu0 %v3153_v0  ;;  %1839 = vmatprep.mubr.bf16.mxu1 %v3153_v0 }
  0xb1   :  { %1848 = vmatprep.subr.bf16.mxu0 %v3321_v57  ;;  %1889 = vmatprep.subr.bf16.mxu1 %v3325_v58 }
  0xb6   :  { %2955 = vmatmul.mubr.msk.bf16.vlgmr.msra.gmra.mrb[60].mxu0 %vm319_vm0, %v3414_v4  ;;  %2956 = vmatmul.mubr.msk.bf16.vlgmr.msra.gmra.mrb[60].mxu1 %vm319_vm0, %v3414_v4 }
  0xb7   :  { %1849 = vmatpush1.bf16.msra.mxu0 %v3335_v61  ;;  %1890 = vmatpush1.bf16.msra.mxu1 %v3337_v1 }
  0xb8   :  { %1880 = vmatprep.mubr.bf16.mxu0 %v3153_v0  ;;  %1921 = vmatprep.mubr.bf16.mxu1 %v3153_v0 }
  0xb9   :  { %1930 = vmatprep.subr.bf16.mxu0 %v3339_v2  ;;  %1971 = vmatprep.subr.bf16.mxu1 %v3343_v3 }
  0xbe   :  { %2957 = vmatmul.mubr.msk.bf16.vlgmr.msra.gmra.mrb[64].mxu0 %vm319_vm0, %v3414_v4  ;;  %2958 = vmatmul.mubr.msk.bf16.vlgmr.msra.gmra.mrb[64].mxu1 %vm319_vm0, %v3414_v4 }
  0xbf   :  { %1931 = vmatpush1.bf16.msra.mxu0 %v3353_v11  ;;  %1972 = vmatpush1.bf16.msra.mxu1 %v3355_v14 }
  0xc0   :  { %1962 = vmatprep.mubr.bf16.mxu0 %v3153_v0  ;;  %2003 = vmatprep.mubr.bf16.mxu1 %v3153_v0 }
  0xc1   :  { %2012 = vmatprep.subr.bf16.mxu0 %v3357_v16  ;;  %2053 = vmatprep.subr.bf16.mxu1 %v3361_v17 }
  0xc6   :  { %2959 = vmatmul.mubr.msk.bf16.vlgmr.msra.gmra.mrb[68].mxu0 %vm319_vm0, %v3414_v4  ;;  %2960 = vmatmul.mubr.msk.bf16.vlgmr.msra.gmra.mrb[68].mxu1 %vm319_vm0, %v3414_v4 }
  0xc7   :  { %2013 = vmatpush1.bf16.msra.mxu0 %v3371_v23  ;;  %2054 = vmatpush1.bf16.msra.mxu1 %v3373_v30 }
  0xc8   :  { %2044 = vmatprep.mubr.bf16.mxu0 %v3153_v0  ;;  %2085 = vmatprep.mubr.bf16.mxu1 %v3153_v0 }
  0xc9   :  { %2094 = vmatprep.subr.bf16.mxu0 %v3375_v31  ;;  %2135 = vmatprep.subr.bf16.mxu1 %v3379_v35 }
  0xce   :  { %2961 = vmatmul.mubr.msk.bf16.vlgmr.msra.gmra.mrb[72].mxu0 %vm319_vm0, %v3414_v4  ;;  %2962 = vmatmul.mubr.msk.bf16.vlgmr.msra.gmra.mrb[72].mxu1 %vm319_vm0, %v3414_v4 }
  0xcf   :  { %2095 = vmatpush1.bf16.msra.mxu0 %v3389_v36  ;;  %2136 = vmatpush1.bf16.msra.mxu1 %v3391_v38 }
  0xd0   :  { %2126 = vmatprep.mubr.bf16.mxu0 %v3153_v0  ;;  %2167 = vmatprep.mubr.bf16.mxu1 %v3153_v0 }
  0xd6   :  { %2963 = vmatmul.mubr.msk.bf16.vlgmr.msra.gmra.mrb[76].mxu0 %vm319_vm0, %v3414_v4  ;;  %2964 = vmatmul.mubr.msk.bf16.vlgmr.msra.gmra.mrb[76].mxu1 %vm319_vm0, %v3414_v4 }
 0x111   :  { %v3509_v6 = vpop.f32.mrb[0].mxu0  ;;  %v3511_v8 = vpop.f32.mrb[0].mxu1 }
 0x112   :  { %v3513_v9 = vpop.f32.mrb[1].mxu0  ;;  %v3515_v10 = vpop.f32.mrb[1].mxu1 }
 0x113   :  { %v361_v15 = vpop.f32.mrb[2].mxu0  ;;  %v402_v19 = vpop.f32.mrb[2].mxu1 }
 0x114   :  { %v362_v20 = vpop.f32.mrb[3].mxu0  ;;  %v403_v21 = vpop.f32.mrb[3].mxu1 }
 0x115   :  { %v1153_v21 = vlaneseq }
 0x119   :  { %v3517_v24 = vpop.f32.mrb[4].mxu0  ;;  %v3519_v0 = vpop.f32.mrb[4].mxu1 }
 0x11a   :  { %v3521_v25 = vpop.f32.mrb[5].mxu0  ;;  %v3523_v26 = vpop.f32.mrb[5].mxu1 }
 0x11b   :  { %v443_v29 = vpop.f32.mrb[6].mxu0  ;;  %v484_v32 = vpop.f32.mrb[6].mxu1 }
 0x11c   :  { %v444_v33 = vpop.f32.mrb[7].mxu0  ;;  %v485_v34 = vpop.f32.mrb[7].mxu1 }
 0x121   :  { %v3525_v37 = vpop.f32.mrb[8].mxu0  ;;  %v3527_v39 = vpop.f32.mrb[8].mxu1 }
 0x122   :  { %v3529_v40 = vpop.f32.mrb[9].mxu0  ;;  %v3531_v41 = vpop.f32.mrb[9].mxu1 }
 0x123   :  { %v525_v42 = vpop.f32.mrb[10].mxu0  ;;  %v566_v43 = vpop.f32.mrb[10].mxu1 }
 0x124   :  { %v526_v44 = vpop.f32.mrb[11].mxu0  ;;  %v567_v45 = vpop.f32.mrb[11].mxu1  ;;  %v1154_v43 = vshrl.u32 %v1153_v21, 7 }
 0x129   :  { %v3533_v46 = vpop.f32.mrb[12].mxu0  ;;  %v3535_v47 = vpop.f32.mrb[12].mxu1 }
 0x12a   :  { %v3537_v48 = vpop.f32.mrb[13].mxu0  ;;  %v3539_v49 = vpop.f32.mrb[13].mxu1 }
 0x12b   :  { %v607_v50 = vpop.f32.mrb[14].mxu0  ;;  %v648_v51 = vpop.f32.mrb[14].mxu1 }
 0x12c   :  { %v608_v52 = vpop.f32.mrb[15].mxu0  ;;  %v649_v53 = vpop.f32.mrb[15].mxu1  ;;  %v3587_v51 = vsub.s32 0, %v1154_v43 }
 0x131   :  { %v3541_v54 = vpop.f32.mrb[16].mxu0  ;;  %v3543_v55 = vpop.f32.mrb[16].mxu1 }
 0x132   :  { %v3545_v56 = vpop.f32.mrb[17].mxu0  ;;  %v3547_v57 = vpop.f32.mrb[17].mxu1 }
 0x133   :  { %v689_v58 = vpop.f32.mrb[18].mxu0  ;;  %v730_v59 = vpop.f32.mrb[18].mxu1 }
 0x134   :  { %v690_v60 = vpop.f32.mrb[19].mxu0  ;;  %v731_v61 = vpop.f32.mrb[19].mxu1  ;;  %v3591_v58 = vld [vmem:[#allocation8] sm:$0xff]  ;;  %v3593_v59 = vsub.s32 2, %v1154_v43 }
 0x135   :  { %v3595_v60 = vsub.s32 1, %v1154_v43 }
 0x139   :  { %v3549_v62 = vpop.f32.mrb[20].mxu0  ;;  %v3551_v63 = vpop.f32.mrb[20].mxu1 }
 0x13a   :  { %v3553_v1 = vpop.f32.mrb[21].mxu0  ;;  %v3555_v2 = vpop.f32.mrb[21].mxu1 }
 0x13b   :  { %v771_v3 = vpop.f32.mrb[22].mxu0  ;;  %v812_v5 = vpop.f32.mrb[22].mxu1 }
 0x13c   :  { %v772_v7 = vpop.f32.mrb[23].mxu0  ;;  %v813_v11 = vpop.f32.mrb[23].mxu1  ;;  %v3597_v5 = vsub.s32 3, %v1154_v43 }
 0x13d   :  { %v1156_v11 = vrot.slane %v3591_v58, %v3587_v51 }
 0x141   :  { %v3557_v12 = vpop.f32.mrb[24].mxu0  ;;  %v3559_v13 = vpop.f32.mrb[24].mxu1 }
 0x142   :  { %v3561_v14 = vpop.f32.mrb[25].mxu0  ;;  %v3563_v16 = vpop.f32.mrb[25].mxu1 }
 0x143   :  { %v853_v17 = vpop.f32.mrb[26].mxu0  ;;  %v894_v18 = vpop.f32.mrb[26].mxu1 }
 0x144   :  { %v854_v22 = vpop.f32.mrb[27].mxu0  ;;  %v895_v23 = vpop.f32.mrb[27].mxu1  ;;  %v1164_v17 = vrot.slane %v3591_v58, %v3593_v59  ;;  %v1160_v18 = vrot.slane %v3591_v58, %v3595_v60 }
 0x145   :  { %v3154_v22 = vmov 1983009808  }
 0x146   :  { %v2349_v23 = vunpack.c.l.s4 %v3154_v22 }
 0x149   :  { %v3565_v27 = vpop.f32.mrb[28].mxu0  ;;  %v3567_v28 = vpop.f32.mrb[28].mxu1 }
 0x14a   :  { %v3569_v30 = vpop.f32.mrb[29].mxu0  ;;  %v3571_v31 = vpop.f32.mrb[29].mxu1 }
 0x14b   :  { %v935_v35 = vpop.f32.mrb[30].mxu0  ;;  %v976_v36 = vpop.f32.mrb[30].mxu1 }
 0x14c   :  { %v936_v38 = vpop.f32.mrb[31].mxu0  ;;  %v977_v4 = vpop.f32.mrb[31].mxu1  ;;  %v1168_v35 = vrot.slane %v3591_v58, %v3597_v5 }
 0x151   :  { %v3573_v15 = vpop.f32.mrb[32].mxu0  ;;  %v3575_v19 = vpop.f32.mrb[32].mxu1 }
 0x152   :  { %v3577_v20 = vpop.f32.mrb[33].mxu0  ;;  %v3579_v29 = vpop.f32.mrb[33].mxu1 }
 0x153   :  { %4006 = vst [vmem:[#allocation13_spill] sm:$0xff] %v3577_v20  ;;  %4007 = vst [vmem:[#allocation14_spill] sm:$0xff] %v3579_v29  ;;  %v1017_v32 = vpop.f32.mrb[34].mxu0  ;;  %v1058_v33 = vpop.f32.mrb[34].mxu1 }
 0x154   :  { %v1018_v34 = vpop.f32.mrb[35].mxu0  ;;  %v1059_v42 = vpop.f32.mrb[35].mxu1  ;;  %v3607_v32 = vsub.s32 4, %v1154_v43  ;;  %v3609_v33 = vsub.s32 6, %v1154_v43 }
 0x155   :  { %v3611_v34 = vsub.s32 5, %v1154_v43 }
 0x159   :  { %v3581_v44 = vpop.f32.mrb[36].mxu0  ;;  %v3583_v45 = vpop.f32.mrb[36].mxu1 }
 0x15a   :  { %4008 = vst [vmem:[#allocation15_spill] sm:$0xff] %v3581_v44  ;;  %4009 = vst [vmem:[#allocation16_spill] sm:$0xff] %v3583_v45  ;;  %v3585_v50 = vpop.f32.mrb[37].mxu0  ;;  %v3589_v52 = vpop.f32.mrb[37].mxu1  ;;  %v1172_v44 = vrot.slane %v3591_v58, %v3607_v32 }
 0x15b   :  { %4010 = vst [vmem:[#allocation17_spill] sm:$0xff] %v3585_v50  ;;  %4011 = vst [vmem:[#allocation18_spill] sm:$0xff] %v3589_v52  ;;  %v1099_v53 = vpop.f32.mrb[38].mxu0  ;;  %v1140_v61 = vpop.f32.mrb[38].mxu1  ;;  %v3613_v52 = vsub.s32 7, %v1154_v43 }
 0x15c   :  { %v1100_v3 = vpop.f32.mrb[39].mxu0  ;;  %v1141_v7 = vpop.f32.mrb[39].mxu1  ;;  %v2350_v61 = vunpack.c.0.s8 %v2349_v23  ;;  %v3623_v23 = vld [vmem:[#allocation8 + $0x10] sm:$0xff] }
 0x161   :  { %v1390_v36 = vpop.f32.mrb[40].mxu0  ;;  %v1431_v4 = vpop.f32.mrb[40].mxu1 }
 0x162   :  { %v1391_v38 = vadd.f32 %v1390_v36, %v1156_v11  ;;  %v1392_v21 = vpop.f32.mrb[41].mxu0  ;;  %v1432_v42 = vadd.f32 %v1431_v4, %v1164_v17  ;;  %v1433_v3 = vpop.f32.mrb[41].mxu1  ;;  %v3615_v11 = vld [vmem:[#allocation8 + $0x8] sm:$0xff]  ;;  %v1180_v17 = vrot.slane %v3591_v58, %v3609_v33 }
 0x163   :  { %v1393_v53 = vadd.f32 %v1392_v21, %v1160_v18  ;;  %v1394_v7 = vpop.f32.mrb[42].mxu0  ;;  %v1434_v22 = vadd.f32 %v1433_v3, %v1168_v35  ;;  %v1435_v50 = vpop.f32.mrb[42].mxu1  ;;  %v1176_v18 = vrot.slane %v3591_v58, %v3611_v34 }
 0x164   :  { %2986 = vrcp.f32 %v1391_v38  ;;  %v1395_v45 = vpop.f32.mrb[43].mxu0  ;;  %v1436_v36 = vpop.f32.mrb[43].mxu1  ;;  %v3625_v38 = vsub.s32 %v2350_v61, %v1154_v43  ;;  %v1188_v50 = vrot.slane %v3615_v11, %v3587_v51  ;;  %v1236_v61 = vrot.slane %v3623_v23, %v3607_v32 }
 0x165   :  { %2988 = vrcp.f32 %v1432_v42  ;;  %v1184_v45 = vrot.slane %v3591_v58, %v3613_v52 }
 0x166   :  { %2990 = vrcp.f32 %v1393_v53  ;;  %v1232_v53 = vrot.slane %v3623_v23, %v3597_v5 }
 0x167   :  { %2992 = vrcp.f32 %v1434_v22 }
 0x169   :  { %v1472_v42 = vpop.f32.mrb[44].mxu0  ;;  %v1513_v22 = vpop.f32.mrb[44].mxu1 }
 0x16a   :  { %v1473_v7 = vadd.f32 %v1472_v42, %v1172_v44  ;;  %v1474_v36 = vpop.f32.mrb[45].mxu0  ;;  %v1514_v4 = vadd.f32 %v1513_v22, %v1180_v17  ;;  %v1515_v35 = vpop.f32.mrb[45].mxu1  ;;  %v1244_v44 = vrot.slane %v3623_v23, %v3609_v33  ;;  %v3657_v42 = vld [vmem:[#allocation8 + $0x18] sm:$0xff]  ;;  %v2187_v22 = vmul.f32 %v3513_v9, %v3513_v9 }
 0x16b   :  { %v1475_v58 = vadd.f32 %v1474_v36, %v1176_v18  ;;  %v1476_v29 = vpop.f32.mrb[46].mxu0  ;;  %v1516_v21 = vadd.f32 %v1515_v35, %v1184_v45  ;;  %v1517_v3 = vpop.f32.mrb[46].mxu1  ;;  %v2188_v18 = vmul.f32 %v3511_v8, %v3511_v8 }
 0x16c   :  { %2994 = vrcp.f32 %v1473_v7  ;;  %v1477_v20 = vpop.f32.mrb[47].mxu0  ;;  %v2186_v29 = vmul.f32 %v3509_v6, %v3509_v6  ;;  %v1518_v7 = vpop.f32.mrb[47].mxu1 }
 0x16d   :  { %2996 = vrcp.f32 %v1514_v4  ;;  %v2189_v20 = vmul.f32 %v3515_v10, %v3515_v10  ;;  %v2190_v10 = vmul.f32 %v3517_v24, %v3517_v24  ;;  %v2191_v7 = vmul.f32 %v3521_v25, %v3521_v25  ;;  %v3705_v25 = vld [vmem:[#allocation8 + $0x20] sm:$0xff] }
 0x16e   :  { %v2987_v45 = vpop.eup %2986  ;;  %2998 = vrcp.f32 %v1475_v58  ;;  %v2192_v58 = vmul.f32 %v3519_v0, %v3519_v0 }
 0x16f   :  { %v2989_v6 = vpop.eup %2988  ;;  %v2266_v36 = vmul.f32 %v2987_v45, %v2186_v29  ;;  %3000 = vrcp.f32 %v1516_v21  ;;  %v2193_v21 = vmul.f32 %v3523_v26, %v3523_v26  ;;  %v3697_v26 = vmul.f32 %v3525_v37, %v3525_v37 }
 0x170   :  { %v2991_v4 = vpop.eup %2990  ;;  %v2268_v3 = vmul.f32 %v2989_v6, %v2188_v18  ;;  %v4012_v6 = vrot.slane %v3615_v11, %v3593_v59  ;;  %v3709_v18 = vmul.f32 %v3527_v39, %v3527_v39 }
 0x171   :  { %v2993_v35 = vpop.eup %2992  ;;  %v2267_v29 = vmul.f32 %v2991_v4, %v2187_v22  ;;  %v1554_v45 = vpop.f32.mrb[48].mxu0 }
 0x172   :  { %v2269_v24 = vmul.f32 %v2993_v35, %v2189_v20  ;;  %v1555_v17 = vadd.f32 %v1554_v45, %v1188_v50  ;;  %v1595_v43 = vpop.f32.mrb[48].mxu1  ;;  %v1556_v0 = vpop.f32.mrb[49].mxu0  ;;  %v4013_v50 = vrot.slane %v3615_v11, %v3595_v60 }
 0x173   :  { %v2346_v22 = vcombine.low %v2266_v36, %v2267_v29  ;;  %v1596_v4 = vadd.f32 %v1595_v43, %v4012_v6  ;;  %v1597_v35 = vpop.f32.mrb[49].mxu1  ;;  %v1558_v45 = vpop.f32.mrb[50].mxu0  ;;  %v4014_v36 = vrot.slane %v3615_v11, %v3597_v5  ;;  %v3716_v6 = vmul.f32 %v3529_v40, %v3529_v40 }
 0x174   :  { %v1557_v20 = vadd.f32 %v1556_v0, %v4013_v50  ;;  %v2347_v37 = vcombine.low %v2268_v3, %v2269_v24  ;;  %3002 = vrcp.f32 %v1555_v17  ;;  %v1599_v8 = vpop.f32.mrb[50].mxu1  ;;  %v1559_v43 = vpop.f32.mrb[51].mxu0  ;;  %v3720_v0 = vmul.f32 %v3531_v41, %v3531_v41 }
 0x175   :  { %v1598_v29 = vadd.f32 %v1597_v35, %v4014_v36  ;;  %v2354_v50 = vrot.slane %v2346_v22, %v3625_v38  ;;  %3004 = vrcp.f32 %v1596_v4  ;;  %v1600_v39 = vpop.f32.mrb[51].mxu1  ;;  %v3734_v45 = vmul.f32 %v3533_v46, %v3533_v46 }
 0x176   :  { %v2995_v3 = vpop.eup %2994  ;;  %v2361_v17 = vrot.slane %v2347_v37, %v3625_v38  ;;  %3006 = vrcp.f32 %v1557_v20  ;;  %v3738_v39 = vmul.f32 %v3535_v47, %v3535_v47 }
 0x177   :  { %v2997_v40 = vpop.eup %2996  ;;  %v2270_v35 = vmul.f32 %v2995_v3, %v2190_v10  ;;  %3008 = vrcp.f32 %v1598_v29  ;;  %v3742_v10 = vmul.f32 %v3537_v48, %v3537_v48  ;;  %v3746_v29 = vmul.f32 %v3539_v49, %v3539_v49 }
 0x178   :  { %v2999_v4 = vpop.eup %2998  ;;  %v2362_v20 = vcombine.low %v2354_v50, %v2361_v17  ;;  %v2965_v37 = vcombine.low %v2361_v17, %v2361_v17  ;;  %v2272_v36 = vmul.f32 %v2997_v40, %v2192_v58  ;;  %v4015_v17 = vrot.slane %v3615_v11, %v3607_v32 }
 0x179   :  { %v3001_v43 = vpop.eup %3000  ;;  %v2271_v3 = vmul.f32 %v2999_v4, %v2191_v7  ;;  %v1636_v22 = vpop.f32.mrb[52].mxu0  ;;  %v4016_v48 = vrot.slane %v3615_v11, %v3609_v33  ;;  %v4017_v49 = vrot.slane %v3615_v11, %v3611_v34 }
 0x17a   :  { %v2575_v46 = vrot.slane %v2362_v20, %v3625_v38  ;;  %v2582_v50 = vrot.slane %v2965_v37, %v3625_v38  ;;  %v2273_v58 = vmul.f32 %v3001_v43, %v2193_v21  ;;  %v1637_v47 = vadd.f32 %v1636_v22, %v4015_v17  ;;  %v1677_v40 = vpop.f32.mrb[52].mxu1  ;;  %v1638_v41 = vpop.f32.mrb[53].mxu0 }
 0x17b   :  { %v2363_v24 = vcombine.low %v2270_v35, %v2271_v3  ;;  %v1678_v8 = vadd.f32 %v1677_v40, %v4016_v48  ;;  %v1639_v7 = vadd.f32 %v1638_v41, %v4017_v49  ;;  %v1679_v4 = vpop.f32.mrb[53].mxu1  ;;  %v1640_v20 = vpop.f32.mrb[54].mxu0  ;;  %v4018_v40 = vrot.slane %v3615_v11, %v3613_v52 }
 0x17c   :  { %v2583_v37 = vcombine.high %v2575_v46, %v2575_v46  ;;  %v1681_v43 = vpop.f32.mrb[54].mxu1  ;;  %v1641_v9 = vpop.f32.mrb[55].mxu0  ;;  %v2364_v41 = vcombine.low %v2272_v36, %v2273_v58  ;;  %3010 = vrcp.f32 %v1637_v47  ;;  %v3777_v11 = vmul.f32 %v3541_v54, %v3541_v54 }
 0x17d   :  { %v2371_v17 = vrot.slane %v2363_v24, %v3625_v38  ;;  %v1680_v48 = vadd.f32 %v1679_v4, %v4018_v40  ;;  %v1682_v49 = vpop.f32.mrb[55].mxu1  ;;  %v2584_v9 = vcombine.high %v2582_v50, %v2582_v50  ;;  %v2779_v43 = vsel %vm2778_vm1, %v2575_v46, 0.0 }
 0x17e   :  { %v3003_v20 = vpop.eup %3002  ;;  %v2780_v22 = vsel %vm2778_vm1, %v2583_v37, 0.0  ;;  %3012 = vrcp.f32 %v1678_v8  ;;  %v2378_v3 = vrot.slane %v2364_v41, %v3625_v38  ;;  %v2782_v58 = vsel %vm2778_vm1, %v2582_v50, 0.0 }
 0x17f   :  { %v3005_v35 = vpop.eup %3004  ;;  %v2781_v21 = vadd.f32 %v2780_v22, %v2779_v43  ;;  %v2274_v24 = vmul.f32 %v3003_v20, %v3697_v26  ;;  %3014 = vrcp.f32 %v1639_v7  ;;  %v3784_v26 = vmul.f32 %v3543_v55, %v3543_v55 }
 0x180   :  { %v3007_v36 = vpop.eup %3006  ;;  %v2276_v47 = vmul.f32 %v3005_v35, %v3709_v18  ;;  %3016 = vrcp.f32 %v1680_v48  ;;  %v2379_v8 = vcombine.low %v2371_v17, %v2378_v3  ;;  %v2966_v37 = vcombine.low %v2378_v3, %v2378_v3 }
 0x181   :  { %v3009_v46 = vpop.eup %3008  ;;  %v2783_v4 = vadd.f32 %v2782_v58, %v2781_v21  ;;  %v2275_v22 = vmul.f32 %v3007_v36, %v3716_v6  ;;  %v1718_v41 = vpop.f32.mrb[56].mxu0  ;;  %v2784_v7 = vsel %vm2778_vm1, %v2584_v9, 0.0  ;;  %v4019_v50 = vrot.slane %v3623_v23, %v3587_v51 }
 0x182   :  { %v2277_v54 = vmul.f32 %v3009_v46, %v3720_v0  ;;  %v1759_v35 = vpop.f32.mrb[56].mxu1  ;;  %v1720_v40 = vpop.f32.mrb[57].mxu0  ;;  %v2592_v21 = vrot.slane %v2379_v8, %v3625_v38  ;;  %v2599_v3 = vrot.slane %v2966_v37, %v3625_v38  ;;  %v4020_v20 = vrot.slane %v3623_v23, %v3593_v59 }
 0x183   :  { %v1719_v18 = vadd.f32 %v1718_v41, %v4019_v50  ;;  %v2785_v6 = vadd.f32 %v2784_v7, %v2783_v4  ;;  %v2380_v17 = vcombine.low %v2274_v24, %v2275_v22  ;;  %v1761_v48 = vpop.f32.mrb[57].mxu1  ;;  %v1722_v49 = vpop.f32.mrb[58].mxu0  ;;  %v4021_v9 = vrot.slane %v3623_v23, %v3595_v60 }
 0x184   :  { %v2381_v55 = vcombine.low %v2276_v47, %v2277_v54  ;;  %v1760_v0 = vadd.f32 %v1759_v35, %v4020_v20  ;;  %v1763_v36 = vpop.f32.mrb[58].mxu1  ;;  %v1723_v58 = vpop.f32.mrb[59].mxu0  ;;  %v3801_v46 = vmul.f32 %v3545_v56, %v3545_v56  ;;  %v2600_v4 = vcombine.high %v2592_v21, %v2592_v21 }
 0x185   :  { %3018 = vrcp.f32 %v1719_v18  ;;  %v1721_v43 = vadd.f32 %v1720_v40, %v4021_v9  ;;  %v2601_v24 = vcombine.high %v2599_v3, %v2599_v3  ;;  %v2786_v8 = vsel %vm2778_vm1, %v2592_v21, 0.0  ;;  %v1764_v47 = vpop.f32.mrb[59].mxu1 }
 0x186   :  { %v2787_v37 = vadd.f32 %v2786_v8, %v2785_v6  ;;  %v2388_v22 = vrot.slane %v2380_v17, %v3625_v38  ;;  %v2395_v41 = vrot.slane %v2381_v55, %v3625_v38  ;;  %3020 = vrcp.f32 %v1760_v0  ;;  %v3011_v7 = vpop.eup %3010 }
 0x187   :  { %v3808_v54 = vmul.f32 %v3547_v57, %v3547_v57  ;;  %v2788_v50 = vsel %vm2778_vm1, %v2600_v4, 0.0  ;;  %3022 = vrcp.f32 %v1721_v43  ;;  %v1762_v56 = vadd.f32 %v1761_v48, %v1232_v53 }
 0x188   :  { %v3013_v18 = vpop.eup %3012  ;;  %v2789_v35 = vadd.f32 %v2788_v50, %v2787_v37  ;;  %v2396_v40 = vcombine.low %v2388_v22, %v2395_v41  ;;  %v2967_v21 = vcombine.low %v2395_v41, %v2395_v41  ;;  %v2278_v6 = vmul.f32 %v3011_v7, %v3734_v45 }
 0x189   :  { %v3015_v17 = vpop.eup %3014  ;;  %v2790_v49 = vsel %vm2778_vm1, %v2599_v3, 0.0  ;;  %v2792_v55 = vsel %vm2778_vm1, %v2601_v24, 0.0  ;;  %v2280_v57 = vmul.f32 %v3013_v18, %v3738_v39  ;;  %3024 = vrcp.f32 %v1762_v56  ;;  %v1800_v20 = vpop.f32.mrb[60].mxu0 }
 0x18a   :  { %v3017_v0 = vpop.eup %3016  ;;  %v2791_v9 = vadd.f32 %v2790_v49, %v2789_v35  ;;  %v2609_v43 = vrot.slane %v2396_v40, %v3625_v38  ;;  %v2616_v53 = vrot.slane %v2967_v21, %v3625_v38  ;;  %v2279_v48 = vmul.f32 %v3015_v17, %v3742_v10  ;;  %v1841_v36 = vpop.f32.mrb[60].mxu1 }
 0x18b   :  { %v1802_v58 = vpop.f32.mrb[61].mxu0  ;;  %v2281_v45 = vmul.f32 %v3017_v0, %v3746_v29  ;;  %v1801_v3 = vadd.f32 %v1800_v20, %v1236_v61  ;;  %v1842_v39 = vadd.f32 %v1841_v36, %v1244_v44  ;;  %v4022_v4 = vrot.slane %v3623_v23, %v3611_v34  ;;  %v1843_v8 = vpop.f32.mrb[61].mxu1 }
 0x18c   :  { %v1804_v47 = vpop.f32.mrb[62].mxu0  ;;  %v3833_v10 = vmul.f32 %v3549_v62, %v3549_v62  ;;  %v2617_v37 = vcombine.high %v2609_v43, %v2609_v43  ;;  %v2793_v29 = vadd.f32 %v2792_v55, %v2791_v9  ;;  %v2794_v22 = vsel %vm2778_vm1, %v2609_v43, 0.0  ;;  %v1845_v41 = vpop.f32.mrb[62].mxu1 }
 0x18d   :  { %v1803_v24 = vadd.f32 %v1802_v58, %v4022_v4  ;;  %v1805_v61 = vpop.f32.mrb[63].mxu0  ;;  %v2618_v7 = vcombine.high %v2616_v53, %v2616_v53  ;;  %v2397_v50 = vcombine.low %v2278_v6, %v2279_v48  ;;  %v2398_v56 = vcombine.low %v2280_v57, %v2281_v45  ;;  %v1846_v44 = vpop.f32.mrb[63].mxu1 }
 0x18e   :  { %3026 = vrcp.f32 %v1801_v3  ;;  %v2208_v35 = vmul.f32 %v3551_v63, %v3551_v63  ;;  %v2795_v40 = vadd.f32 %v2794_v22, %v2793_v29  ;;  %v2796_v21 = vsel %vm2778_vm1, %v2617_v37, 0.0 }
 0x18f   :  { %v3019_v18 = vpop.eup %3018  ;;  %3028 = vrcp.f32 %v1842_v39  ;;  %v2405_v62 = vrot.slane %v2397_v50, %v3625_v38  ;;  %v2412_v17 = vrot.slane %v2398_v56, %v3625_v38  ;;  %v2207_v6 = vmul.f32 %v3553_v1, %v3553_v1 }
 0x190   :  { %v2282_v49 = vmul.f32 %v3019_v18, %v3777_v11  ;;  %3030 = vrcp.f32 %v1803_v24  ;;  %v3021_v55 = vpop.eup %3020  ;;  %v2797_v57 = vadd.f32 %v2796_v21, %v2795_v40  ;;  %v2798_v20 = vsel %vm2778_vm1, %v2616_v53, 0.0 }
 0x191   :  { %v4023_v63 = vrot.slane %v3623_v23, %v3613_v52  ;;  %v3023_v9 = vpop.eup %3022  ;;  %v2800_v43 = vsel %vm2778_vm1, %v2618_v7, 0.0  ;;  %v2413_v48 = vcombine.low %v2405_v62, %v2412_v17  ;;  %v2968_v36 = vcombine.low %v2412_v17, %v2412_v17  ;;  %v1882_v11 = vpop.f32.mrb[64].mxu0 }
 0x192   :  { %v2284_v58 = vmul.f32 %v3021_v55, %v3784_v26  ;;  %v2799_v45 = vadd.f32 %v2798_v20, %v2797_v57  ;;  %v2283_v3 = vmul.f32 %v3023_v9, %v3801_v46  ;;  %v4024_v1 = vrot.slane %v3657_v42, %v3587_v51  ;;  %v1923_v39 = vpop.f32.mrb[64].mxu1  ;;  %v1884_v4 = vpop.f32.mrb[65].mxu0 }
 0x193   :  { %v1844_v0 = vadd.f32 %v1843_v8, %v4023_v63  ;;  %v3025_v23 = vpop.eup %3024  ;;  %v2626_v24 = vrot.slane %v2413_v48, %v3625_v38  ;;  %v2633_v8 = vrot.slane %v2968_v36, %v3625_v38  ;;  %v4025_v47 = vrot.slane %v3657_v42, %v3593_v59  ;;  %v1925_v29 = vpop.f32.mrb[65].mxu1 }
 0x194   :  { %v1883_v53 = vadd.f32 %v1882_v11, %v4024_v1  ;;  %v4026_v37 = vrot.slane %v3657_v42, %v3595_v60  ;;  %v1886_v22 = vpop.f32.mrb[66].mxu0  ;;  %v2801_v41 = vadd.f32 %v2800_v43, %v2799_v45  ;;  %v2414_v61 = vcombine.low %v2282_v49, %v2283_v3  ;;  %v1927_v50 = vpop.f32.mrb[66].mxu1 }
 0x195   :  { %3032 = vrcp.f32 %v1844_v0  ;;  %v1924_v26 = vadd.f32 %v1923_v39, %v4025_v47  ;;  %v2285_v7 = vmul.f32 %v3025_v23, %v3808_v54  ;;  %v1887_v56 = vpop.f32.mrb[67].mxu0  ;;  %v2209_v44 = vmul.f32 %v3555_v2, %v3555_v2  ;;  %v1928_v62 = vpop.f32.mrb[67].mxu1 }
 0x196   :  { %v1885_v46 = vadd.f32 %v1884_v4, %v4026_v37  ;;  %3034 = vrcp.f32 %v1883_v53  ;;  %v2210_v18 = vmul.f32 %v3557_v12, %v3557_v12  ;;  %v2634_v40 = vcombine.high %v2626_v24, %v2626_v24 }
 0x197   :  { %v2802_v21 = vsel %vm2778_vm1, %v2626_v24, 0.0  ;;  %v2422_v55 = vrot.slane %v2414_v61, %v3625_v38  ;;  %v2415_v57 = vcombine.low %v2284_v58, %v2285_v7  ;;  %3036 = vrcp.f32 %v1924_v26 }
 0x198   :  { %v2803_v17 = vadd.f32 %v2802_v21, %v2801_v41  ;;  %v3027_v49 = vpop.eup %3026  ;;  %v2635_v54 = vcombine.high %v2633_v8, %v2633_v8  ;;  %v2804_v20 = vsel %vm2778_vm1, %v2634_v40, 0.0  ;;  %3038 = vrcp.f32 %v1885_v46 }
 0x199   :  { %v4027_v2 = vrot.slane %v3657_v42, %v3597_v5  ;;  %v3029_v0 = vpop.eup %3028  ;;  %v2212_v12 = vmul.f32 %v3559_v13, %v3559_v13  ;;  %v2429_v43 = vrot.slane %v2415_v57, %v3625_v38  ;;  %v2286_v48 = vmul.f32 %v3027_v49, %v3833_v10  ;;  %v1964_v3 = vpop.f32.mrb[68].mxu0 }
 0x19a   :  { %v2805_v9 = vadd.f32 %v2804_v20, %v2803_v17  ;;  %v3031_v36 = vpop.eup %3030  ;;  %v2211_v58 = vmul.f32 %v3561_v14, %v3561_v14  ;;  %v2806_v11 = vsel %vm2778_vm1, %v2633_v8, 0.0  ;;  %v2288_v45 = vmul.f32 %v3029_v0, %v2208_v35  ;;  %v2005_v23 = vpop.f32.mrb[68].mxu1 }
 0x19b   :  { %v1926_v63 = vadd.f32 %v1925_v29, %v4027_v2  ;;  %v2430_v53 = vcombine.low %v2422_v55, %v2429_v43  ;;  %v2969_v39 = vcombine.low %v2429_v43, %v2429_v43  ;;  %v2287_v4 = vmul.f32 %v3031_v36, %v2207_v6  ;;  %v1966_v13 = vpop.f32.mrb[69].mxu0  ;;  %v2007_v26 = vpop.f32.mrb[69].mxu1 }
 0x19c   :  { %v2807_v1 = vadd.f32 %v2806_v11, %v2805_v9  ;;  %v2213_v24 = vmul.f32 %v3563_v16, %v3563_v16  ;;  %v2808_v10 = vsel %vm2778_vm1, %v2635_v54, 0.0  ;;  %v4028_v47 = vrot.slane %v3657_v42, %v3607_v32  ;;  %v1968_v37 = vpop.f32.mrb[70].mxu0  ;;  %v2009_v16 = vpop.f32.mrb[70].mxu1 }
 0x19d   :  { %3040 = vrcp.f32 %v1926_v63  ;;  %v4029_v35 = vrot.slane %v3657_v42, %v3609_v33  ;;  %v2643_v6 = vrot.slane %v2430_v53, %v3625_v38  ;;  %v2650_v29 = vrot.slane %v2969_v39, %v3625_v38  ;;  %v1969_v61 = vpop.f32.mrb[71].mxu0  ;;  %v2010_v21 = vpop.f32.mrb[71].mxu1 }
 0x19e   :  { %v1965_v14 = vadd.f32 %v1964_v3, %v4028_v47  ;;  %v2809_v22 = vadd.f32 %v2808_v10, %v2807_v1  ;;  %v2431_v41 = vcombine.low %v2286_v48, %v2287_v4  ;;  %v2214_v7 = vmul.f32 %v3565_v27, %v3565_v27 }
 0x19f   :  { %v2006_v8 = vadd.f32 %v2005_v23, %v4029_v35  ;;  %v3033_v46 = vpop.eup %3032  ;;  %v4030_v56 = vrot.slane %v3657_v42, %v3611_v34  ;;  %v2651_v17 = vcombine.high %v2643_v6, %v2643_v6  ;;  %v2652_v55 = vcombine.high %v2650_v29, %v2650_v29 }
 0x1a0   :  { %v2289_v50 = vmul.f32 %v3033_v46, %v2209_v44  ;;  %3042 = vrcp.f32 %v1965_v14  ;;  %v3035_v62 = vpop.eup %3034  ;;  %v2810_v57 = vsel %vm2778_vm1, %v2643_v6, 0.0  ;;  %v4031_v49 = vrot.slane %v3657_v42, %v3613_v52 }
 0x1a1   :  { %v1967_v40 = vadd.f32 %v1966_v13, %v4030_v56  ;;  %v2811_v20 = vadd.f32 %v2810_v57, %v2809_v22  ;;  %v2439_v2 = vrot.slane %v2431_v41, %v3625_v38  ;;  %v2290_v44 = vmul.f32 %v3035_v62, %v2210_v18  ;;  %v3037_v63 = vpop.eup %3036  ;;  %v2046_v3 = vpop.f32.mrb[72].mxu0 }
 0x1a2   :  { %v2008_v54 = vadd.f32 %v2007_v26, %v4031_v49  ;;  %v2432_v27 = vcombine.low %v2288_v45, %v2289_v50  ;;  %v2216_v0 = vmul.f32 %v3567_v28, %v3567_v28  ;;  %v2812_v9 = vsel %vm2778_vm1, %v2651_v17, 0.0  ;;  %v3039_v48 = vpop.eup %3038  ;;  %v2087_v53 = vpop.f32.mrb[72].mxu1 }
 0x1a3   :  { %v2814_v43 = vsel %vm2778_vm1, %v2650_v29, 0.0  ;;  %3044 = vrcp.f32 %v2006_v8  ;;  %v2813_v36 = vadd.f32 %v2812_v9, %v2811_v20  ;;  %v2292_v42 = vmul.f32 %v3037_v63, %v2212_v12  ;;  %v2048_v39 = vpop.f32.mrb[73].mxu0  ;;  %v2089_v14 = vpop.f32.mrb[73].mxu1 }
 0x1a4   :  { %v2446_v11 = vrot.slane %v2432_v27, %v3625_v38  ;;  %3046 = vrcp.f32 %v1967_v40  ;;  %v2816_v1 = vsel %vm2778_vm1, %v2652_v55, 0.0  ;;  %v2291_v45 = vmul.f32 %v3039_v48, %v2211_v58  ;;  %v2050_v35 = vpop.f32.mrb[74].mxu0  ;;  %v2091_v37 = vpop.f32.mrb[74].mxu1 }
 0x1a5   :  { %3048 = vrcp.f32 %v2008_v54  ;;  %v4032_v18 = vrot.slane %v3705_v25, %v3587_v51  ;;  %v2815_v23 = vadd.f32 %v2814_v43, %v2813_v36  ;;  %v4033_v47 = vrot.slane %v3705_v25, %v3593_v59  ;;  %v2051_v46 = vpop.f32.mrb[75].mxu0  ;;  %v2092_v41 = vpop.f32.mrb[75].mxu1 }
 0x1a6   :  { %v2447_v13 = vcombine.low %v2439_v2, %v2446_v11  ;;  %v2970_v10 = vcombine.low %v2446_v11, %v2446_v11  ;;  %v2448_v8 = vcombine.low %v2290_v44, %v2291_v45  ;;  %v4034_v58 = vrot.slane %v3705_v25, %v3595_v60 }
 0x1a7   :  { %v2047_v28 = vadd.f32 %v2046_v3, %v4032_v18  ;;  %v3041_v4 = vpop.eup %3040  ;;  %v2088_v12 = vadd.f32 %v2087_v53, %v4033_v47  ;;  %v2817_v22 = vadd.f32 %v2816_v1, %v2815_v23  ;;  %v2215_v60 = vmul.f32 %v3569_v30, %v3569_v30  ;;  %v4040_v47 = vld [vmem:[#allocation13_spill] sm:$0xff] }
 0x1a8   :  { %v2293_v26 = vmul.f32 %v3041_v4, %v2213_v24  ;;  %v2049_v51 = vadd.f32 %v2048_v39, %v4034_v58  ;;  %v2660_v6 = vrot.slane %v2447_v13, %v3625_v38  ;;  %v2667_v29 = vrot.slane %v2970_v10, %v3625_v38  ;;  %v4041_v58 = vld [vmem:[#allocation14_spill] sm:$0xff] }
 0x1a9   :  { %3050 = vrcp.f32 %v2047_v28  ;;  %v2456_v59 = vrot.slane %v2448_v8, %v3625_v38  ;;  %v4035_v24 = vrot.slane %v3705_v25, %v3597_v5  ;;  %v2217_v56 = vmul.f32 %v3571_v31, %v3571_v31  ;;  %v2128_v54 = vpop.f32.mrb[76].mxu0 }
 0x1aa   :  { %3052 = vrcp.f32 %v2088_v12  ;;  %v2449_v16 = vcombine.low %v2292_v42, %v2293_v26  ;;  %v3043_v50 = vpop.eup %3042  ;;  %v2668_v40 = vcombine.high %v2660_v6, %v2660_v6  ;;  %v2818_v21 = vsel %vm2778_vm1, %v2660_v6, 0.0  ;;  %v2130_v9 = vpop.f32.mrb[77].mxu0 }
 0x1ab   :  { %3054 = vrcp.f32 %v2049_v51  ;;  %v2090_v61 = vadd.f32 %v2089_v14, %v4035_v24  ;;  %v2819_v62 = vadd.f32 %v2818_v21, %v2817_v22  ;;  %v2294_v55 = vmul.f32 %v3043_v50, %v2214_v7  ;;  %v2169_v7 = vpop.f32.mrb[76].mxu1  ;;  %v2132_v1 = vpop.f32.mrb[78].mxu0 }
 0x1ac   :  { %v2463_v17 = vrot.slane %v2449_v16, %v3625_v38  ;;  %v2218_v57 = vmul.f32 %v3573_v15, %v3573_v15  ;;  %v2220_v5 = vmul.f32 %v3575_v19, %v3575_v19  ;;  %v2669_v49 = vcombine.high %v2667_v29, %v2667_v29  ;;  %v2171_v3 = vpop.f32.mrb[77].mxu1  ;;  %v2133_v4 = vpop.f32.mrb[79].mxu0  ;;  %v4044_v1 = vld [vmem:[#allocation17_spill] sm:$0xff] }
 0x1ad   :  { %3056 = vrcp.f32 %v2090_v61  ;;  %v2820_v30 = vsel %vm2778_vm1, %v2668_v40, 0.0  ;;  %v3045_v20 = vpop.eup %3044  ;;  %v4036_v44 = vrot.slane %v3705_v25, %v3607_v32  ;;  %v2822_v15 = vsel %vm2778_vm1, %v2667_v29, 0.0  ;;  %v2173_v39 = vpop.f32.mrb[78].mxu1 }
 0x1ae   :  { %v2821_v31 = vadd.f32 %v2820_v30, %v2819_v62  ;;  %v2464_v2 = vcombine.low %v2456_v59, %v2463_v17  ;;  %v2971_v27 = vcombine.low %v2463_v17, %v2463_v17  ;;  %v3047_v43 = vpop.eup %3046  ;;  %v2296_v48 = vmul.f32 %v3045_v20, %v2216_v0  ;;  %v2174_v13 = vpop.f32.mrb[79].mxu1 }
 0x1af   :  { %v2129_v63 = vadd.f32 %v2128_v54, %v4036_v44  ;;  %v4037_v19 = vrot.slane %v3705_v25, %v3609_v33  ;;  %v4038_v11 = vrot.slane %v3705_v25, %v3611_v34  ;;  %v3049_v45 = vpop.eup %3048  ;;  %v2295_v53 = vmul.f32 %v3047_v43, %v2215_v60  ;;  %v4042_v54 = vld [vmem:[#allocation15_spill] sm:$0xff] }
 0x1b0   :  { %v2823_v18 = vadd.f32 %v2822_v15, %v2821_v31  ;;  %v2677_v32 = vrot.slane %v2464_v2, %v3625_v38  ;;  %v2684_v28 = vrot.slane %v2971_v27, %v3625_v38  ;;  %v2824_v0 = vsel %vm2778_vm1, %v2669_v49, 0.0 }
 0x1b1   :  { %v2170_v36 = vadd.f32 %v2169_v7, %v4037_v19  ;;  %v2131_v42 = vadd.f32 %v2130_v9, %v4038_v11  ;;  %v2297_v23 = vmul.f32 %v3049_v45, %v2217_v56  ;;  %3058 = vrcp.f32 %v2129_v63 }
 0x1b2   :  { %v4039_v33 = vrot.slane %v3705_v25, %v3613_v52  ;;  %v2219_v12 = vmul.f32 %v4040_v47, %v4040_v47  ;;  %v2685_v14 = vcombine.high %v2677_v32, %v2677_v32  ;;  %v2825_v35 = vadd.f32 %v2824_v0, %v2823_v18 }
 0x1b3   :  { %v3051_v10 = vpop.eup %3050  ;;  %v2826_v8 = vsel %vm2778_vm1, %v2677_v32, 0.0  ;;  %v2221_v51 = vmul.f32 %v4041_v58, %v4041_v58  ;;  %v2465_v37 = vcombine.low %v2294_v55, %v2295_v53  ;;  %v2466_v46 = vcombine.low %v2296_v48, %v2297_v23  ;;  %v4045_v53 = vld [vmem:[#allocation18_spill] sm:$0xff] }
 0x1b4   :  { %v2172_v34 = vadd.f32 %v2171_v3, %v4039_v33  ;;  %v3053_v26 = vpop.eup %3052  ;;  %v2298_v6 = vmul.f32 %v3051_v10, %v2218_v57  ;;  %v2686_v22 = vcombine.high %v2684_v28, %v2684_v28  ;;  %v2827_v52 = vadd.f32 %v2826_v8, %v2825_v35 }
 0x1b5   :  { %v3055_v29 = vpop.eup %3054  ;;  %v2828_v25 = vsel %vm2778_vm1, %v2685_v14, 0.0  ;;  %v2300_v41 = vmul.f32 %v3053_v26, %v2220_v5  ;;  %v2473_v59 = vrot.slane %v2465_v37, %v3625_v38  ;;  %v2480_v16 = vrot.slane %v2466_v46, %v3625_v38 }
 0x1b6   :  { %v2299_v24 = vmul.f32 %v3055_v29, %v2219_v12  ;;  %3060 = vrcp.f32 %v2170_v36  ;;  %v2829_v50 = vadd.f32 %v2828_v25, %v2827_v52  ;;  %v2830_v60 = vsel %vm2778_vm1, %v2684_v28, 0.0  ;;  %v4043_v36 = vld [vmem:[#allocation16_spill] sm:$0xff] }
 0x1b7   :  { %v3057_v61 = vpop.eup %3056  ;;  %3062 = vrcp.f32 %v2131_v42  ;;  %v2481_v56 = vcombine.low %v2473_v59, %v2480_v16  ;;  %v2972_v40 = vcombine.low %v2480_v16, %v2480_v16  ;;  %v2832_v55 = vsel %vm2778_vm1, %v2686_v22, 0.0 }
 0x1b8   :  { %v2482_v21 = vcombine.low %v2298_v6, %v2299_v24  ;;  %v2301_v62 = vmul.f32 %v3057_v61, %v2221_v51  ;;  %v2831_v17 = vadd.f32 %v2830_v60, %v2829_v50  ;;  %3064 = vrcp.f32 %v2172_v34 }
 0x1b9   :  { %v2694_v57 = vrot.slane %v2481_v56, %v3625_v38  ;;  %v2701_v5 = vrot.slane %v2972_v40, %v3625_v38  ;;  %v2222_v20 = vmul.f32 %v4042_v54, %v4042_v54  ;;  %v2224_v11 = vmul.f32 %v4043_v36, %v4043_v36 }
 0x1ba   :  { %v2490_v49 = vrot.slane %v2482_v21, %v3625_v38  ;;  %v2483_v30 = vcombine.low %v2300_v41, %v2301_v62  ;;  %v2833_v31 = vadd.f32 %v2832_v55, %v2831_v17  ;;  %v2223_v45 = vmul.f32 %v4044_v1, %v4044_v1 }
 0x1bb   :  { %v3059_v2 = vpop.eup %3058  ;;  %v2702_v27 = vcombine.high %v2694_v57, %v2694_v57  ;;  %v2834_v44 = vsel %vm2778_vm1, %v2694_v57, 0.0  ;;  %v2703_v9 = vcombine.high %v2701_v5, %v2701_v5  ;;  %v2838_v32 = vsel %vm2778_vm1, %v2701_v5, 0.0 }
 0x1bc   :  { %v2497_v63 = vrot.slane %v2483_v30, %v3625_v38  ;;  %v2302_v7 = vmul.f32 %v3059_v2, %v2222_v20  ;;  %v2835_v43 = vadd.f32 %v2834_v44, %v2833_v31  ;;  %v2225_v39 = vmul.f32 %v4045_v53, %v4045_v53 }
 0x1bd   :  { %v2836_v19 = vsel %vm2778_vm1, %v2702_v27, 0.0  ;;  %v2840_v23 = vsel %vm2778_vm1, %v2703_v9, 0.0 }
 0x1be   :  { %v2498_v15 = vcombine.low %v2490_v49, %v2497_v63  ;;  %v2973_v48 = vcombine.low %v2497_v63, %v2497_v63  ;;  %v2837_v42 = vadd.f32 %v2836_v19, %v2835_v43 }
 0x1c0   :  { %v3061_v3 = vpop.eup %3060  ;;  %v2711_v18 = vrot.slane %v2498_v15, %v3625_v38  ;;  %v2839_v0 = vadd.f32 %v2838_v32, %v2837_v42  ;;  %v2718_v34 = vrot.slane %v2973_v48, %v3625_v38 }
 0x1c1   :  { %v3063_v28 = vpop.eup %3062  ;;  %v2304_v4 = vmul.f32 %v3061_v3, %v2224_v11 }
 0x1c2   :  { %v2303_v33 = vmul.f32 %v3063_v28, %v2223_v45  ;;  %v2719_v13 = vcombine.high %v2711_v18, %v2711_v18  ;;  %v2842_v10 = vsel %vm2778_vm1, %v2711_v18, 0.0  ;;  %v3065_v47 = vpop.eup %3064  ;;  %v2841_v12 = vadd.f32 %v2840_v23, %v2839_v0 }
 0x1c3   :  { %v2305_v35 = vmul.f32 %v3065_v47, %v2225_v39  ;;  %v2720_v37 = vcombine.high %v2718_v34, %v2718_v34  ;;  %v2846_v29 = vsel %vm2778_vm1, %v2718_v34, 0.0 }
 0x1c4   :  { %v2499_v14 = vcombine.low %v2302_v7, %v2303_v33  ;;  %v2844_v8 = vsel %vm2778_vm1, %v2719_v13, 0.0  ;;  %v2843_v26 = vadd.f32 %v2842_v10, %v2841_v12 }
 0x1c5   :  { %v2500_v58 = vcombine.low %v2304_v4, %v2305_v35  ;;  %v2848_v41 = vsel %vm2778_vm1, %v2720_v37, 0.0 }
 0x1c6   :  { %v2507_v51 = vrot.slane %v2499_v14, %v3625_v38  ;;  %v2845_v46 = vadd.f32 %v2844_v8, %v2843_v26 }
 0x1c7   :  { %v2514_v6 = vrot.slane %v2500_v58, %v3625_v38 }
 0x1c8   :  { %v2847_v22 = vadd.f32 %v2846_v29, %v2845_v46 }
 0x1c9   :  { %v2515_v52 = vcombine.low %v2507_v51, %v2514_v6  ;;  %v2974_v25 = vcombine.low %v2514_v6, %v2514_v6 }
 0x1ca   :  { %v2849_v59 = vadd.f32 %v2848_v41, %v2847_v22 }
 0x1cb   :  { %v2728_v16 = vrot.slane %v2515_v52, %v3625_v38  ;;  %v2735_v24 = vrot.slane %v2974_v25, %v3625_v38 }
 0x1cd   :  { %v2736_v61 = vcombine.high %v2728_v16, %v2728_v16  ;;  %v2850_v50 = vsel %vm2778_vm1, %v2728_v16, 0.0  ;;  %v2737_v56 = vcombine.high %v2735_v24, %v2735_v24  ;;  %v2854_v62 = vsel %vm2778_vm1, %v2735_v24, 0.0 }
 0x1ce   :  { %v2851_v60 = vadd.f32 %v2850_v50, %v2849_v59 }
 0x1cf   :  { %v2852_v40 = vsel %vm2778_vm1, %v2736_v61, 0.0  ;;  %v2856_v55 = vsel %vm2778_vm1, %v2737_v56, 0.0 }
 0x1d0   :  { %v2853_v21 = vadd.f32 %v2852_v40, %v2851_v60 }
 0x1d2   :  { %v2855_v17 = vadd.f32 %v2854_v62, %v2853_v21 }
 0x1d4   :  { %v2857_v57 = vadd.f32 %v2856_v55, %v2855_v17 }
 0x1d6   :  { %2858 = vadd.xlane.f32.xlu0 %v2857_v57 }
 0x263   :  { %v2859_v5 = vpop.xlane.xlu0 %2858 }
 0x264   :  { %v2860_v49 = vrot.slane %v2859_v5, 4 }
 0x266   :  { %v2861_v30 = vadd.f32 %v2860_v49, %v2859_v5 }
 0x268   :  { %v2862_v54 = vrot.slane %v2861_v30, 2 }
 0x26a   :  { %v2863_v38 = vadd.f32 %v2862_v54, %v2861_v30 }
 0x26c   :  { %v2864_v20 = vrot.slane %v2863_v38, 1 }
 0x26e   :  { %v2865_v31 = vadd.f32 %v2864_v20, %v2863_v38 }
 0x270   :  { %2975 = vpush %v2865_v31 }
 0x2a1   :  { %s2976_s1 = spop %2975 }
 0x2a2   :  { %s2867_s26 = smul.f32 9.8039214e-05, %s2976_s1 }
 0x2a4   :  { %2869 = sst [smem:[#allocation9]] %s2867_s26 }
 0x2a5   :  { %3141 = shalt.err (!%p3138_p12)
}
 0x2a6   :  { %s3155_s8 = smov [#allocation9]  }
 0x2a7   :  { %2877 = dma.smem_to_hbm %s3155_s8, 16, %s4005_s4, [#allocation5]  }
 0x2a8   :  { %3146 = dma.done.wait [#allocation5], 16  }
 0x2a9   :  { %3147 = vsyncadd [#allocation5], 4294967280 }
 0x2aa   :  { %2881 = sfence }
 0x2ab   :  { %2882 = vsyncpa [#allocation4], 1 }
 0x2ac   :  { %2883 = vsyncpa [#allocation7], 1 }
 0x2ad   :  { %2884 = vsyncpa [#allocation5], 1 }

</bundles_post_ra>
